<compile_context>
chip_gen: v5e
topology: v5e:2x2
jax: 0.10.0
libtpu: 0.0.40
codegen_flags: <defaults>
</compile_context>

<pallas_src>
import functools
import math

import jax
import jax.numpy as jnp
from jax import lax
from jax.experimental import pallas as pl
from jax.experimental.pallas import tpu as pltpu


def _layernorm(x, w, b, eps=1e-5):
    mu = jnp.mean(x, axis=-1, keepdims=True)
    var = jnp.mean((x - mu) ** 2, axis=-1, keepdims=True)
    return (x - mu) * lax.rsqrt(var + eps) * w + b


def _gelu_exact(x):
    # torch.nn.GELU() default = exact erf-based GELU
    return 0.5 * x * (1.0 + lax.erf(x * (1.0 / math.sqrt(2.0))))


def encoder_stack_kernel(x_ref, la1w_ref, la1b_ref, wqkv_ref, wo_ref, bo_ref,
                         la2w_ref, la2b_ref, w1_ref, b1_ref, w2_ref, b2_ref,
                         o_ref, act_ref, qkv_ref, attn_ref, *,
                         head, feats, seq, batch_block, compute_dtype):
    cd = compute_dtype
    bb, n, f = batch_block, seq, feats
    dh = f // head
    inv_sqrt_d = 1.0 / (f ** 0.5)           # matches PyTorch self.sqrt_d = feats ** 0.5
    l = pl.program_id(1)

    # Load the activation from HBM only on the first layer of this batch block.
    @pl.when(l == 0)
    def _():
        act_ref[...] = x_ref[...].reshape(bb * n, f).astype(jnp.float32)

    x = act_ref[...]

    # ---- LayerNorm 1 (f32) + fused QKV projection: one (bb*N, F) @ (F, 3F) matmul ----
    h1 = _layernorm(x, la1w_ref[0], la1b_ref[0])
    qkv_ref[...] = jnp.dot(h1.astype(cd), wqkv_ref[0],
                           preferred_element_type=jnp.float32).astype(cd)

    # ---- attention per (batch row, head); ctx written into feature columns of attn_ref ----
    for b in range(bb):                      # static unroll; ref slices keep live ranges small
        r0 = b * n
        for h in range(head):
            c0 = h * dh
            qh = qkv_ref[r0:r0 + n, c0:c0 + dh]
            kh = qkv_ref[r0:r0 + n, f + c0:f + c0 + dh]
            vh = qkv_ref[r0:r0 + n, 2 * f + c0:2 * f + c0 + dh]
            # contract the last dims directly: no explicit kh.T transpose/relayout
            dots = lax.dot_general(qh, kh, (((1,), (1,)), ((), ())),
                                   preferred_element_type=jnp.float32) * inv_sqrt_d
            m = jnp.max(dots, axis=-1, keepdims=True)
            e = jnp.exp(dots - m)
            denom = jnp.sum(e, axis=-1, keepdims=True)
            score = e * pl.reciprocal(denom, approx=True)     # EUP, off the VPU
            ctx = jnp.dot(score.astype(cd), vh, preferred_element_type=jnp.float32)
            attn_ref[r0:r0 + n, c0:c0 + dh] = ctx.astype(cd)

    # ---- ONE wide output projection (K = F fully fills the MXU) + bias + residual ----
    msa = jnp.dot(attn_ref[...], wo_ref[0], preferred_element_type=jnp.float32)
    out1 = msa + bo_ref[0] + x

    # ---- LayerNorm 2 + MLP (GELU on both projections, matching the reference module) ----
    h2 = _layernorm(out1, la2w_ref[0], la2b_ref[0])
    m1 = _gelu_exact(jnp.dot(h2.astype(cd), w1_ref[0],
                             preferred_element_type=jnp.float32) + b1_ref[0])
    m2 = _gelu_exact(jnp.dot(m1.astype(cd), w2_ref[0],
                             preferred_element_type=jnp.float32) + b2_ref[0])

    act_ref[...] = m2 + out1                 # carried to the next layer in VMEM

    # Write the result to HBM only after the last layer.
    @pl.when(l == pl.num_programs(1) - 1)
    def _():
        o_ref[...] = act_ref[...].reshape(bb, n, f).astype(o_ref.dtype)


def _default_vmem_limit():
    # Leave headroom below physical VMEM (64 MiB on v7x, 128 MiB on v5e/v6e).
    try:
        cap = int(pltpu.get_tpu_info().vmem_capacity_bytes)
        return max(min(96 * 1024 * 1024, int(cap * 0.75)), 16 * 1024 * 1024)
    except Exception:
        return 48 * 1024 * 1024


def prepare_stack_params(layer_params, compute_dtype):
    """Fold channel-selection vectors into weights, fuse QKV, cast, stack across layers."""
    cd = compute_dtype
    f32 = jnp.float32

    def one(p):
        # (h1 @ W) * sel == h1 @ (W * sel[None, :])  (exact); fuse q/k/v along out dim.
        wqkv = jnp.concatenate([p["wq"] * p["sel1"],
                                p["wk"] * p["sel1"],
                                p["wv"] * p["sel1"]], axis=1)
        return {
            "la1w": p["la1w"].astype(f32), "la1b": p["la1b"].astype(f32),
            "wqkv": wqkv.astype(cd),
            "wo": p["wo"].astype(cd), "bo": p["bo"].astype(f32),
            "la2w": p["la2w"].astype(f32), "la2b": p["la2b"].astype(f32),
            "w1": p["w1"].astype(cd), "b1": p["b1"].astype(f32),
            # (m1 * sel2) @ W2 == m1 @ (W2 * sel2[:, None])  (exact)
            "w2": (p["w2"] * p["sel2"][0][:, None]).astype(cd),
            "b2": p["b2"].astype(f32),
        }

    prepped = [one(p) for p in layer_params]
    return {k: jnp.stack([pp[k] for pp in prepped], axis=0) for k in prepped[0]}


def transformer_forward(x, layer_params, head, *, batch_block=1,
                        compute_dtype=jnp.float32, vmem_limit_bytes=None):
    sp = prepare_stack_params(layer_params, compute_dtype)
    B, N, F = x.shape
    L = int(sp["wqkv"].shape[0])
    Hm = int(sp["w1"].shape[2])
    bb = batch_block
    assert B % bb == 0, "batch_block must divide batch size"
    if vmem_limit_bytes is None:
        vmem_limit_bytes = _default_vmem_limit()

    kern = functools.partial(encoder_stack_kernel, head=head, feats=F, seq=N,
                             batch_block=bb, compute_dtype=compute_dtype)

    def wspec(shape):
        # per-layer weight slab: index varies along the layer grid axis only, so the
        # default double buffering prefetches layer l+1's weights behind layer l's compute.
        return pl.BlockSpec((1,) + shape, lambda i, l: (l, 0, 0))

    in_specs = [
        pl.BlockSpec((bb, N, F), lambda i, l: (i, 0, 0)),   # x (constant over l -> one fetch / block)
        wspec((1, F)), wspec((1, F)),                       # la1 w, b
        wspec((F, 3 * F)),                                  # fused wqkv (sel1 folded)
        wspec((F, F)), wspec((1, F)),                       # wo, bo
        wspec((1, F)), wspec((1, F)),                       # la2 w, b
        wspec((F, Hm)), wspec((1, Hm)),                     # mlp1 w, b
        wspec((Hm, F)), wspec((1, F)),                      # mlp2 w (sel2 folded), b
    ]
    out_spec = pl.BlockSpec((bb, N, F), lambda i, l: (i, 0, 0))

    # Advisory cost estimate so XLA schedules around this long-running call sensibly.
    flops = L * B * N * (2 * F * 3 * F + 2 * F * F + 4 * F * Hm) + L * B * 4 * N * N * F
    transcendentals = L * B * N * (N * head + Hm + F)
    weight_bytes = sum(int(v.size) * v.dtype.itemsize for v in sp.values())
    bytes_accessed = weight_bytes * (B // bb) + 2 * int(x.size) * x.dtype.itemsize

    return pl.pallas_call(
        kern,
        out_shape=jax.ShapeDtypeStruct((B, N, F), x.dtype),
        grid=(B // bb, L),                                   # layer axis innermost
        in_specs=in_specs,
        out_specs=out_spec,
        scratch_shapes=[
            pltpu.VMEM((bb * N, F), jnp.float32),            # persistent activation carry
            pltpu.VMEM((bb * N, 3 * F), compute_dtype),      # q|k|v
            pltpu.VMEM((bb * N, F), compute_dtype),          # per-head ctx -> wide wo matmul
        ],
        compiler_params=pltpu.CompilerParams(
            dimension_semantics=("parallel", "arbitrary"),
            vmem_limit_bytes=vmem_limit_bytes),
        cost_estimate=pl.CostEstimate(flops=int(flops),
                                      transcendentals=int(transcendentals),
                                      bytes_accessed=int(bytes_accessed)),
    )(x, sp["la1w"], sp["la1b"], sp["wqkv"], sp["wo"], sp["bo"],
      sp["la2w"], sp["la2b"], sp["w1"], sp["b1"], sp["w2"], sp["b2"])


# ---------------- pure-JAX reference (matches the PyTorch module) ----------------
def encoder_ref(x, p, head):
    B, N, F = x.shape
    dh = F // head
    h1 = _layernorm(x, p["la1w"][0], p["la1b"][0])
    q = (h1 @ p["wq"]) * p["sel1"][0]
    k = (h1 @ p["wk"]) * p["sel1"][0]
    v = (h1 @ p["wv"]) * p["sel1"][0]
    q = q.reshape(B, N, head, dh).transpose(0, 2, 1, 3)
    k = k.reshape(B, N, head, dh).transpose(0, 2, 1, 3)
    v = v.reshape(B, N, head, dh).transpose(0, 2, 1, 3)
    dots = jnp.einsum("bhif,bhjf->bhij", q, k) / (F ** 0.5)
    score = jax.nn.softmax(dots, axis=-1)
    attn = jnp.einsum("bhij,bhjf->bihf", score, v).reshape(B, N, F)
    msa = attn @ p["wo"] + p["bo"][0]
    out1 = msa + x
    h2 = _layernorm(out1, p["la2w"][0], p["la2b"][0])
    m1 = _gelu_exact(h2 @ p["w1"] + p["b1"][0]) * p["sel2"][0]
    m2 = _gelu_exact(m1 @ p["w2"] + p["b2"][0])
    return m2 + out1


def transformer_ref(x, layer_params, head):
    for p in layer_params:
        x = encoder_ref(x, p, head)
    return x


# ---------------- deterministic parameter init ----------------
def init_layer_params(key, feats, mlp_hidden):
    ks = jax.random.split(key, 8)
    s = 0.05
    return {
        "la1w": jnp.ones((1, feats), jnp.float32),
        "la1b": jnp.zeros((1, feats), jnp.float32),
        "wq": s * jax.random.normal(ks[0], (feats, feats), jnp.float32),
        "wk": s * jax.random.normal(ks[1], (feats, feats), jnp.float32),
        "wv": s * jax.random.normal(ks[2], (feats, feats), jnp.float32),
        "sel1": jnp.ones((1, feats), jnp.float32),      # channel_selection2.indexes init = ones
        "wo": s * jax.random.normal(ks[3], (feats, feats), jnp.float32),
        "bo": s * jax.random.normal(ks[4], (1, feats), jnp.float32),
        "la2w": jnp.ones((1, feats), jnp.float32),
        "la2b": jnp.zeros((1, feats), jnp.float32),
        "w1": s * jax.random.normal(ks[5], (feats, mlp_hidden), jnp.float32),
        "b1": s * jax.random.normal(ks[6], (1, mlp_hidden), jnp.float32),
        "sel2": jnp.ones((1, mlp_hidden), jnp.float32),
        "w2": s * jax.random.normal(ks[7], (mlp_hidden, feats), jnp.float32),
        "b2": jnp.zeros((1, feats), jnp.float32),
    }


if __name__ == "__main__":
    B, N, hidden, mlp_hidden, head, num_layers = 2, 8, 32, 64, 4, 2

    root = jax.random.PRNGKey(0)
    x_key, *layer_keys = jax.random.split(root, num_layers + 1)
    x = jax.random.normal(x_key, (B, N, hidden), jnp.float32)
    layer_params = [init_layer_params(k, hidden, mlp_hidden) for k in layer_keys]

    ref = jax.block_until_ready(transformer_ref(x, layer_params, head))

    # f32, batch_block=1: grid (2 batch blocks x 2 layers) -> 2 parallel steps (megacore-shardable).
    out = jax.block_until_ready(
        transformer_forward(x, layer_params, head,
                            batch_block=1, compute_dtype=jnp.float32))
    assert out.shape == (B, N, hidden)
    assert jnp.allclose(out, ref, rtol=2e-3, atol=2e-3), \
        "Pallas (f32, bb=1) output mismatch vs JAX reference"

    # f32, whole batch folded into one block (dense sublanes at this tiny shape).
    out_bb = jax.block_until_ready(
        transformer_forward(x, layer_params, head,
                            batch_block=B, compute_dtype=jnp.float32))
    assert jnp.allclose(out_bb, ref, rtol=2e-3, atol=2e-3), \
        "Pallas (f32, bb=B) output mismatch vs JAX reference"

    # bf16-operand run (v5e/v6e/v7x fast path): bf16 matmul operands, f32 accumulation.
    out_bf16 = jax.block_until_ready(
        transformer_forward(x, layer_params, head,
                            batch_block=1, compute_dtype=jnp.bfloat16))
    assert out_bf16.shape == (B, N, hidden)
    assert bool(jnp.all(jnp.isfinite(out_bf16)))
    assert jnp.allclose(out_bf16, ref, rtol=5e-2, atol=5e-2), \
        "Pallas (bf16 operands) output mismatch vs JAX reference"

    print("KERNEL_OK")
</pallas_src>

<mosaic_0001>
module attributes {stable_mosaic.version = 11 : i64} {
  func.func @encoder_stack_kernel(%arg0: i32, %arg1: i32, %arg2: memref<1x8x32xf32, #tpu.memory_space<vmem>>, %arg3: memref<1x1x32xf32, #tpu.memory_space<vmem>>, %arg4: memref<1x1x32xf32, #tpu.memory_space<vmem>>, %arg5: memref<1x32x96xf32, #tpu.memory_space<vmem>>, %arg6: memref<1x32x32xf32, #tpu.memory_space<vmem>>, %arg7: memref<1x1x32xf32, #tpu.memory_space<vmem>>, %arg8: memref<1x1x32xf32, #tpu.memory_space<vmem>>, %arg9: memref<1x1x32xf32, #tpu.memory_space<vmem>>, %arg10: memref<1x32x64xf32, #tpu.memory_space<vmem>>, %arg11: memref<1x1x64xf32, #tpu.memory_space<vmem>>, %arg12: memref<1x64x32xf32, #tpu.memory_space<vmem>>, %arg13: memref<1x1x32xf32, #tpu.memory_space<vmem>>, %arg14: memref<1x8x32xf32, #tpu.memory_space<vmem>>, %arg15: memref<8x32xf32, #tpu.memory_space<vmem>>, %arg16: memref<8x96xf32, #tpu.memory_space<vmem>>, %arg17: memref<8x32xf32, #tpu.memory_space<vmem>>) attributes {dimension_semantics = [#tpu.dimension_semantics<parallel>, #tpu.dimension_semantics<arbitrary>], iteration_bounds = array<i64: 2, 2>, scalar_prefetch = 0 : i64, scratch_operands = 3 : i64, tpu.core_type = #tpu.core_type<tc>, window_params = [{transform_indices = @transform_0, window_bounds = array<i64: 1, 8, 32>}, {transform_indices = @transform_1, window_bounds = array<i64: 1, 1, 32>}, {transform_indices = @transform_2, window_bounds = array<i64: 1, 1, 32>}, {transform_indices = @transform_3, window_bounds = array<i64: 1, 32, 96>}, {transform_indices = @transform_4, window_bounds = array<i64: 1, 32, 32>}, {transform_indices = @transform_5, window_bounds = array<i64: 1, 1, 32>}, {transform_indices = @transform_6, window_bounds = array<i64: 1, 1, 32>}, {transform_indices = @transform_7, window_bounds = array<i64: 1, 1, 32>}, {transform_indices = @transform_8, window_bounds = array<i64: 1, 32, 64>}, {transform_indices = @transform_9, window_bounds = array<i64: 1, 1, 64>}, {transform_indices = @transform_10, window_bounds = array<i64: 1, 64, 32>}, {transform_indices = @transform_11, window_bounds = array<i64: 1, 1, 32>}, {transform_indices = @transform_12, window_bounds = array<i64: 1, 8, 32>}]} {
    %c0_i32 = arith.constant 0 : i32
    %0 = arith.cmpi eq, %arg1, %c0_i32 : i32
    %1 = arith.extui %0 : i1 to i32
    %c0_i32_0 = arith.constant 0 : i32
    %2 = arith.cmpi ne, %1, %c0_i32_0 : i32
    scf.if %2 {
      %c0_102 = arith.constant 0 : index
      %c0_103 = arith.constant 0 : index
      %c0_104 = arith.constant 0 : index
      %176 = vector.load %arg2[%c0_102, %c0_103, %c0_104] : memref<1x8x32xf32, #tpu.memory_space<vmem>>, vector<1x8x32xf32>
      %177 = vector.shape_cast %176 : vector<1x8x32xf32> to vector<8x32xf32>
      %c0_105 = arith.constant 0 : index
      %c0_106 = arith.constant 0 : index
      %178 = vector.load %arg15[%c0_105, %c0_106] : memref<8x32xf32, #tpu.memory_space<vmem>>, vector<8x32xf32>
      tpu.vector_store %arg15[%c0_105, %c0_106], %177 {strides = array<i32>} : memref<8x32xf32, #tpu.memory_space<vmem>>, vector<8x32xf32>,
    } else {
    }
    %c0 = arith.constant 0 : index
    %c0_1 = arith.constant 0 : index
    %3 = vector.load %arg15[%c0, %c0_1] : memref<8x32xf32, #tpu.memory_space<vmem>>, vector<8x32xf32>
    %c0_2 = arith.constant 0 : index
    %c0_3 = arith.constant 0 : index
    %c0_4 = arith.constant 0 : index
    %4 = vector.load %arg3[%c0_2, %c0_3, %c0_4] : memref<1x1x32xf32, #tpu.memory_space<vmem>>, vector<1x1x32xf32>
    %5 = vector.shape_cast %4 : vector<1x1x32xf32> to vector<1x32xf32>
    %c0_5 = arith.constant 0 : index
    %c0_6 = arith.constant 0 : index
    %c0_7 = arith.constant 0 : index
    %6 = vector.load %arg4[%c0_5, %c0_6, %c0_7] : memref<1x1x32xf32, #tpu.memory_space<vmem>>, vector<1x1x32xf32>
    %7 = vector.shape_cast %6 : vector<1x1x32xf32> to vector<1x32xf32>
    %cst = arith.constant dense<0.000000e+00> : vector<8xf32>
    %8 = vector.multi_reduction <add>, %3, %cst [1] : vector<8x32xf32> to vector<8xf32>
    %9 = vector.shape_cast %8 : vector<8xf32> to vector<8x1xf32>
    %cst_8 = arith.constant 3.200000e+01 : f32
    %10 = vector.broadcast %cst_8 : f32 to vector<8x1xf32>
    %11 = arith.divf %9, %10 : vector<8x1xf32>
    %12 = vector.broadcast %11 : vector<8x1xf32> to vector<8x32xf32>
    %13 = arith.subf %3, %12 : vector<8x32xf32>
    %14 = arith.mulf %13, %13 : vector<8x32xf32>
    %cst_9 = arith.constant dense<0.000000e+00> : vector<8xf32>
    %15 = vector.multi_reduction <add>, %14, %cst_9 [1] : vector<8x32xf32> to vector<8xf32>
    %16 = vector.shape_cast %15 : vector<8xf32> to vector<8x1xf32>
    %cst_10 = arith.constant 3.200000e+01 : f32
    %17 = vector.broadcast %cst_10 : f32 to vector<8x1xf32>
    %18 = arith.divf %16, %17 : vector<8x1xf32>
    %19 = vector.broadcast %11 : vector<8x1xf32> to vector<8x32xf32>
    %20 = arith.subf %3, %19 : vector<8x32xf32>
    %cst_11 = arith.constant 9.99999974E-6 : f32
    %21 = vector.broadcast %cst_11 : f32 to vector<8x1xf32>
    %22 = arith.addf %18, %21 : vector<8x1xf32>
    %23 = math.rsqrt %22 : vector<8x1xf32>
    %24 = vector.broadcast %23 : vector<8x1xf32> to vector<8x32xf32>
    %25 = arith.mulf %20, %24 : vector<8x32xf32>
    %26 = vector.broadcast %5 : vector<1x32xf32> to vector<8x32xf32>
    %27 = arith.mulf %25, %26 : vector<8x32xf32>
    %28 = vector.broadcast %7 : vector<1x32xf32> to vector<8x32xf32>
    %29 = arith.addf %27, %28 : vector<8x32xf32>
    %c0_12 = arith.constant 0 : index
    %c0_13 = arith.constant 0 : index
    %c0_14 = arith.constant 0 : index
    %30 = vector.load %arg5[%c0_12, %c0_13, %c0_14] : memref<1x32x96xf32, #tpu.memory_space<vmem>>, vector<1x32x96xf32>
    %31 = vector.shape_cast %30 : vector<1x32x96xf32> to vector<32x96xf32>
    %cst_15 = arith.constant dense<0.000000e+00> : vector<8x96xf32>
    %32 = tpu.matmul %29, %31, %cst_15 {dimension_numbers = #tpu.dot_dimension_numbers<[1], [0], [0], [1], [0, 0, 1, 1], [], []>} : vector<8x32xf32>, vector<32x96xf32>, vector<8x96xf32> -> vector<8x96xf32>
    %c0_16 = arith.constant 0 : index
    %c0_17 = arith.constant 0 : index
    %33 = vector.load %arg16[%c0_16, %c0_17] : memref<8x96xf32, #tpu.memory_space<vmem>>, vector<8x96xf32>
    tpu.vector_store %arg16[%c0_16, %c0_17], %32 {strides = array<i32>} : memref<8x96xf32, #tpu.memory_space<vmem>>, vector<8x96xf32>,
    %c0_18 = arith.constant 0 : index
    %c0_19 = arith.constant 0 : index
    %34 = vector.load %arg16[%c0_18, %c0_19] : memref<8x96xf32, #tpu.memory_space<vmem>>, vector<8x8xf32>
    %c0_20 = arith.constant 0 : index
    %c32 = arith.constant 32 : index
    %35 = vector.load %arg16[%c0_20, %c32] : memref<8x96xf32, #tpu.memory_space<vmem>>, vector<8x8xf32>
    %c0_21 = arith.constant 0 : index
    %c64 = arith.constant 64 : index
    %36 = vector.load %arg16[%c0_21, %c64] : memref<8x96xf32, #tpu.memory_space<vmem>>, vector<8x8xf32>
    %cst_22 = arith.constant dense<0.000000e+00> : vector<8x8xf32>
    %37 = tpu.matmul %34, %35, %cst_22 {dimension_numbers = #tpu.dot_dimension_numbers<[1], [1], [0], [0], [0, 0, 1, 0], [], []>} : vector<8x8xf32>, vector<8x8xf32>, vector<8x8xf32> -> vector<8x8xf32>
    %cst_23 = arith.constant 0.176776692 : f32
    %38 = vector.broadcast %cst_23 : f32 to vector<8x8xf32>
    %39 = arith.mulf %37, %38 : vector<8x8xf32>
    %cst_24 = arith.constant dense<0xFF800000> : vector<8xf32>
    %40 = vector.multi_reduction <maximumf>, %39, %cst_24 [1] : vector<8x8xf32> to vector<8xf32>
    %41 = vector.shape_cast %40 : vector<8xf32> to vector<8x1xf32>
    %42 = vector.broadcast %41 : vector<8x1xf32> to vector<8x8xf32>
    %43 = arith.subf %39, %42 : vector<8x8xf32>
    %44 = math.exp %43 : vector<8x8xf32>
    %cst_25 = arith.constant dense<0.000000e+00> : vector<8xf32>
    %45 = vector.multi_reduction <add>, %44, %cst_25 [1] : vector<8x8xf32> to vector<8xf32>
    %46 = vector.shape_cast %45 : vector<8xf32> to vector<8x1xf32>
    %47 = tpu.reciprocal %46 {approx = true} : vector<8x1xf32> -> vector<8x1xf32>
    %48 = vector.broadcast %47 : vector<8x1xf32> to vector<8x8xf32>
    %49 = arith.mulf %44, %48 : vector<8x8xf32>
    %cst_26 = arith.constant dense<0.000000e+00> : vector<8x8xf32>
    %50 = tpu.matmul %49, %36, %cst_26 {dimension_numbers = #tpu.dot_dimension_numbers<[1], [0], [0], [1], [0, 0, 1, 1], [], []>} : vector<8x8xf32>, vector<8x8xf32>, vector<8x8xf32> -> vector<8x8xf32>
    %c0_27 = arith.constant 0 : index
    %c0_28 = arith.constant 0 : index
    %51 = vector.load %arg17[%c0_27, %c0_28] : memref<8x32xf32, #tpu.memory_space<vmem>>, vector<8x8xf32>
    tpu.vector_store %arg17[%c0_27, %c0_28], %50 {strides = array<i32>} : memref<8x32xf32, #tpu.memory_space<vmem>>, vector<8x8xf32>,
    %c0_29 = arith.constant 0 : index
    %c8 = arith.constant 8 : index
    %52 = vector.load %arg16[%c0_29, %c8] : memref<8x96xf32, #tpu.memory_space<vmem>>, vector<8x8xf32>
    %c0_30 = arith.constant 0 : index
    %c40 = arith.constant 40 : index
    %53 = vector.load %arg16[%c0_30, %c40] : memref<8x96xf32, #tpu.memory_space<vmem>>, vector<8x8xf32>
    %c0_31 = arith.constant 0 : index
    %c72 = arith.constant 72 : index
    %54 = vector.load %arg16[%c0_31, %c72] : memref<8x96xf32, #tpu.memory_space<vmem>>, vector<8x8xf32>
    %cst_32 = arith.constant dense<0.000000e+00> : vector<8x8xf32>
    %55 = tpu.matmul %52, %53, %cst_32 {dimension_numbers = #tpu.dot_dimension_numbers<[1], [1], [0], [0], [0, 0, 1, 0], [], []>} : vector<8x8xf32>, vector<8x8xf32>, vector<8x8xf32> -> vector<8x8xf32>
    %cst_33 = arith.constant 0.176776692 : f32
    %56 = vector.broadcast %cst_33 : f32 to vector<8x8xf32>
    %57 = arith.mulf %55, %56 : vector<8x8xf32>
    %cst_34 = arith.constant dense<0xFF800000> : vector<8xf32>
    %58 = vector.multi_reduction <maximumf>, %57, %cst_34 [1] : vector<8x8xf32> to vector<8xf32>
    %59 = vector.shape_cast %58 : vector<8xf32> to vector<8x1xf32>
    %60 = vector.broadcast %59 : vector<8x1xf32> to vector<8x8xf32>
    %61 = arith.subf %57, %60 : vector<8x8xf32>
    %62 = math.exp %61 : vector<8x8xf32>
    %cst_35 = arith.constant dense<0.000000e+00> : vector<8xf32>
    %63 = vector.multi_reduction <add>, %62, %cst_35 [1] : vector<8x8xf32> to vector<8xf32>
    %64 = vector.shape_cast %63 : vector<8xf32> to vector<8x1xf32>
    %65 = tpu.reciprocal %64 {approx = true} : vector<8x1xf32> -> vector<8x1xf32>
    %66 = vector.broadcast %65 : vector<8x1xf32> to vector<8x8xf32>
    %67 = arith.mulf %62, %66 : vector<8x8xf32>
    %cst_36 = arith.constant dense<0.000000e+00> : vector<8x8xf32>
    %68 = tpu.matmul %67, %54, %cst_36 {dimension_numbers = #tpu.dot_dimension_numbers<[1], [0], [0], [1], [0, 0, 1, 1], [], []>} : vector<8x8xf32>, vector<8x8xf32>, vector<8x8xf32> -> vector<8x8xf32>
    %c0_37 = arith.constant 0 : index
    %c8_38 = arith.constant 8 : index
    %69 = vector.load %arg17[%c0_37, %c8_38] : memref<8x32xf32, #tpu.memory_space<vmem>>, vector<8x8xf32>
    tpu.vector_store %arg17[%c0_37, %c8_38], %68 {strides = array<i32>} : memref<8x32xf32, #tpu.memory_space<vmem>>, vector<8x8xf32>,
    %c0_39 = arith.constant 0 : index
    %c16 = arith.constant 16 : index
    %70 = vector.load %arg16[%c0_39, %c16] : memref<8x96xf32, #tpu.memory_space<vmem>>, vector<8x8xf32>
    %c0_40 = arith.constant 0 : index
    %c48 = arith.constant 48 : index
    %71 = vector.load %arg16[%c0_40, %c48] : memref<8x96xf32, #tpu.memory_space<vmem>>, vector<8x8xf32>
    %c0_41 = arith.constant 0 : index
    %c80 = arith.constant 80 : index
    %72 = vector.load %arg16[%c0_41, %c80] : memref<8x96xf32, #tpu.memory_space<vmem>>, vector<8x8xf32>
    %cst_42 = arith.constant dense<0.000000e+00> : vector<8x8xf32>
    %73 = tpu.matmul %70, %71, %cst_42 {dimension_numbers = #tpu.dot_dimension_numbers<[1], [1], [0], [0], [0, 0, 1, 0], [], []>} : vector<8x8xf32>, vector<8x8xf32>, vector<8x8xf32> -> vector<8x8xf32>
    %cst_43 = arith.constant 0.176776692 : f32
    %74 = vector.broadcast %cst_43 : f32 to vector<8x8xf32>
    %75 = arith.mulf %73, %74 : vector<8x8xf32>
    %cst_44 = arith.constant dense<0xFF800000> : vector<8xf32>
    %76 = vector.multi_reduction <maximumf>, %75, %cst_44 [1] : vector<8x8xf32> to vector<8xf32>
    %77 = vector.shape_cast %76 : vector<8xf32> to vector<8x1xf32>
    %78 = vector.broadcast %77 : vector<8x1xf32> to vector<8x8xf32>
    %79 = arith.subf %75, %78 : vector<8x8xf32>
    %80 = math.exp %79 : vector<8x8xf32>
    %cst_45 = arith.constant dense<0.000000e+00> : vector<8xf32>
    %81 = vector.multi_reduction <add>, %80, %cst_45 [1] : vector<8x8xf32> to vector<8xf32>
    %82 = vector.shape_cast %81 : vector<8xf32> to vector<8x1xf32>
    %83 = tpu.reciprocal %82 {approx = true} : vector<8x1xf32> -> vector<8x1xf32>
    %84 = vector.broadcast %83 : vector<8x1xf32> to vector<8x8xf32>
    %85 = arith.mulf %80, %84 : vector<8x8xf32>
    %cst_46 = arith.constant dense<0.000000e+00> : vector<8x8xf32>
    %86 = tpu.matmul %85, %72, %cst_46 {dimension_numbers = #tpu.dot_dimension_numbers<[1], [0], [0], [1], [0, 0, 1, 1], [], []>} : vector<8x8xf32>, vector<8x8xf32>, vector<8x8xf32> -> vector<8x8xf32>
    %c0_47 = arith.constant 0 : index
    %c16_48 = arith.constant 16 : index
    %87 = vector.load %arg17[%c0_47, %c16_48] : memref<8x32xf32, #tpu.memory_space<vmem>>, vector<8x8xf32>
    tpu.vector_store %arg17[%c0_47, %c16_48], %86 {strides = array<i32>} : memref<8x32xf32, #tpu.memory_space<vmem>>, vector<8x8xf32>,
    %c0_49 = arith.constant 0 : index
    %c24 = arith.constant 24 : index
    %88 = vector.load %arg16[%c0_49, %c24] : memref<8x96xf32, #tpu.memory_space<vmem>>, vector<8x8xf32>
    %c0_50 = arith.constant 0 : index
    %c56 = arith.constant 56 : index
    %89 = vector.load %arg16[%c0_50, %c56] : memref<8x96xf32, #tpu.memory_space<vmem>>, vector<8x8xf32>
    %c0_51 = arith.constant 0 : index
    %c88 = arith.constant 88 : index
    %90 = vector.load %arg16[%c0_51, %c88] : memref<8x96xf32, #tpu.memory_space<vmem>>, vector<8x8xf32>
    %cst_52 = arith.constant dense<0.000000e+00> : vector<8x8xf32>
    %91 = tpu.matmul %88, %89, %cst_52 {dimension_numbers = #tpu.dot_dimension_numbers<[1], [1], [0], [0], [0, 0, 1, 0], [], []>} : vector<8x8xf32>, vector<8x8xf32>, vector<8x8xf32> -> vector<8x8xf32>
    %cst_53 = arith.constant 0.176776692 : f32
    %92 = vector.broadcast %cst_53 : f32 to vector<8x8xf32>
    %93 = arith.mulf %91, %92 : vector<8x8xf32>
    %cst_54 = arith.constant dense<0xFF800000> : vector<8xf32>
    %94 = vector.multi_reduction <maximumf>, %93, %cst_54 [1] : vector<8x8xf32> to vector<8xf32>
    %95 = vector.shape_cast %94 : vector<8xf32> to vector<8x1xf32>
    %96 = vector.broadcast %95 : vector<8x1xf32> to vector<8x8xf32>
    %97 = arith.subf %93, %96 : vector<8x8xf32>
    %98 = math.exp %97 : vector<8x8xf32>
    %cst_55 = arith.constant dense<0.000000e+00> : vector<8xf32>
    %99 = vector.multi_reduction <add>, %98, %cst_55 [1] : vector<8x8xf32> to vector<8xf32>
    %100 = vector.shape_cast %99 : vector<8xf32> to vector<8x1xf32>
    %101 = tpu.reciprocal %100 {approx = true} : vector<8x1xf32> -> vector<8x1xf32>
    %102 = vector.broadcast %101 : vector<8x1xf32> to vector<8x8xf32>
    %103 = arith.mulf %98, %102 : vector<8x8xf32>
    %cst_56 = arith.constant dense<0.000000e+00> : vector<8x8xf32>
    %104 = tpu.matmul %103, %90, %cst_56 {dimension_numbers = #tpu.dot_dimension_numbers<[1], [0], [0], [1], [0, 0, 1, 1], [], []>} : vector<8x8xf32>, vector<8x8xf32>, vector<8x8xf32> -> vector<8x8xf32>
    %c0_57 = arith.constant 0 : index
    %c24_58 = arith.constant 24 : index
    %105 = vector.load %arg17[%c0_57, %c24_58] : memref<8x32xf32, #tpu.memory_space<vmem>>, vector<8x8xf32>
    tpu.vector_store %arg17[%c0_57, %c24_58], %104 {strides = array<i32>} : memref<8x32xf32, #tpu.memory_space<vmem>>, vector<8x8xf32>,
    %c0_59 = arith.constant 0 : index
    %c0_60 = arith.constant 0 : index
    %106 = vector.load %arg17[%c0_59, %c0_60] : memref<8x32xf32, #tpu.memory_space<vmem>>, vector<8x32xf32>
    %c0_61 = arith.constant 0 : index
    %c0_62 = arith.constant 0 : index
    %c0_63 = arith.constant 0 : index
    %107 = vector.load %arg6[%c0_61, %c0_62, %c0_63] : memref<1x32x32xf32, #tpu.memory_space<vmem>>, vector<1x32x32xf32>
    %108 = vector.shape_cast %107 : vector<1x32x32xf32> to vector<32x32xf32>
    %cst_64 = arith.constant dense<0.000000e+00> : vector<8x32xf32>
    %109 = tpu.matmul %106, %108, %cst_64 {dimension_numbers = #tpu.dot_dimension_numbers<[1], [0], [0], [1], [0, 0, 1, 1], [], []>} : vector<8x32xf32>, vector<32x32xf32>, vector<8x32xf32> -> vector<8x32xf32>
    %c0_65 = arith.constant 0 : index
    %c0_66 = arith.constant 0 : index
    %c0_67 = arith.constant 0 : index
    %110 = vector.load %arg7[%c0_65, %c0_66, %c0_67] : memref<1x1x32xf32, #tpu.memory_space<vmem>>, vector<1x1x32xf32>
    %111 = vector.shape_cast %110 : vector<1x1x32xf32> to vector<1x32xf32>
    %112 = vector.broadcast %111 : vector<1x32xf32> to vector<8x32xf32>
    %113 = arith.addf %109, %112 : vector<8x32xf32>
    %114 = arith.addf %113, %3 : vector<8x32xf32>
    %c0_68 = arith.constant 0 : index
    %c0_69 = arith.constant 0 : index
    %c0_70 = arith.constant 0 : index
    %115 = vector.load %arg8[%c0_68, %c0_69, %c0_70] : memref<1x1x32xf32, #tpu.memory_space<vmem>>, vector<1x1x32xf32>
    %116 = vector.shape_cast %115 : vector<1x1x32xf32> to vector<1x32xf32>
    %c0_71 = arith.constant 0 : index
    %c0_72 = arith.constant 0 : index
    %c0_73 = arith.constant 0 : index
    %117 = vector.load %arg9[%c0_71, %c0_72, %c0_73] : memref<1x1x32xf32, #tpu.memory_space<vmem>>, vector<1x1x32xf32>
    %118 = vector.shape_cast %117 : vector<1x1x32xf32> to vector<1x32xf32>
    %cst_74 = arith.constant dense<0.000000e+00> : vector<8xf32>
    %119 = vector.multi_reduction <add>, %114, %cst_74 [1] : vector<8x32xf32> to vector<8xf32>
    %120 = vector.shape_cast %119 : vector<8xf32> to vector<8x1xf32>
    %cst_75 = arith.constant 3.200000e+01 : f32
    %121 = vector.broadcast %cst_75 : f32 to vector<8x1xf32>
    %122 = arith.divf %120, %121 : vector<8x1xf32>
    %123 = vector.broadcast %122 : vector<8x1xf32> to vector<8x32xf32>
    %124 = arith.subf %114, %123 : vector<8x32xf32>
    %125 = arith.mulf %124, %124 : vector<8x32xf32>
    %cst_76 = arith.constant dense<0.000000e+00> : vector<8xf32>
    %126 = vector.multi_reduction <add>, %125, %cst_76 [1] : vector<8x32xf32> to vector<8xf32>
    %127 = vector.shape_cast %126 : vector<8xf32> to vector<8x1xf32>
    %cst_77 = arith.constant 3.200000e+01 : f32
    %128 = vector.broadcast %cst_77 : f32 to vector<8x1xf32>
    %129 = arith.divf %127, %128 : vector<8x1xf32>
    %130 = vector.broadcast %122 : vector<8x1xf32> to vector<8x32xf32>
    %131 = arith.subf %114, %130 : vector<8x32xf32>
    %cst_78 = arith.constant 9.99999974E-6 : f32
    %132 = vector.broadcast %cst_78 : f32 to vector<8x1xf32>
    %133 = arith.addf %129, %132 : vector<8x1xf32>
    %134 = math.rsqrt %133 : vector<8x1xf32>
    %135 = vector.broadcast %134 : vector<8x1xf32> to vector<8x32xf32>
    %136 = arith.mulf %131, %135 : vector<8x32xf32>
    %137 = vector.broadcast %116 : vector<1x32xf32> to vector<8x32xf32>
    %138 = arith.mulf %136, %137 : vector<8x32xf32>
    %139 = vector.broadcast %118 : vector<1x32xf32> to vector<8x32xf32>
    %140 = arith.addf %138, %139 : vector<8x32xf32>
    %c0_79 = arith.constant 0 : index
    %c0_80 = arith.constant 0 : index
    %c0_81 = arith.constant 0 : index
    %141 = vector.load %arg10[%c0_79, %c0_80, %c0_81] : memref<1x32x64xf32, #tpu.memory_space<vmem>>, vector<1x32x64xf32>
    %142 = vector.shape_cast %141 : vector<1x32x64xf32> to vector<32x64xf32>
    %cst_82 = arith.constant dense<0.000000e+00> : vector<8x64xf32>
    %143 = tpu.matmul %140, %142, %cst_82 {dimension_numbers = #tpu.dot_dimension_numbers<[1], [0], [0], [1], [0, 0, 1, 1], [], []>} : vector<8x32xf32>, vector<32x64xf32>, vector<8x64xf32> -> vector<8x64xf32>
    %c0_83 = arith.constant 0 : index
    %c0_84 = arith.constant 0 : index
    %c0_85 = arith.constant 0 : index
    %144 = vector.load %arg11[%c0_83, %c0_84, %c0_85] : memref<1x1x64xf32, #tpu.memory_space<vmem>>, vector<1x1x64xf32>
    %145 = vector.shape_cast %144 : vector<1x1x64xf32> to vector<1x64xf32>
    %146 = vector.broadcast %145 : vector<1x64xf32> to vector<8x64xf32>
    %147 = arith.addf %143, %146 : vector<8x64xf32>
    %cst_86 = arith.constant 5.000000e-01 : f32
    %148 = vector.broadcast %cst_86 : f32 to vector<8x64xf32>
    %149 = arith.mulf %148, %147 : vector<8x64xf32>
    %cst_87 = arith.constant 0.707106769 : f32
    %150 = vector.broadcast %cst_87 : f32 to vector<8x64xf32>
    %151 = arith.mulf %147, %150 : vector<8x64xf32>
    %152 = math.erf %151 : vector<8x64xf32>
    %cst_88 = arith.constant 1.000000e+00 : f32
    %153 = vector.broadcast %cst_88 : f32 to vector<8x64xf32>
    %154 = arith.addf %153, %152 : vector<8x64xf32>
    %155 = arith.mulf %149, %154 : vector<8x64xf32>
    %c0_89 = arith.constant 0 : index
    %c0_90 = arith.constant 0 : index
    %c0_91 = arith.constant 0 : index
    %156 = vector.load %arg12[%c0_89, %c0_90, %c0_91] : memref<1x64x32xf32, #tpu.memory_space<vmem>>, vector<1x64x32xf32>
    %157 = vector.shape_cast %156 : vector<1x64x32xf32> to vector<64x32xf32>
    %cst_92 = arith.constant dense<0.000000e+00> : vector<8x32xf32>
    %158 = tpu.matmul %155, %157, %cst_92 {dimension_numbers = #tpu.dot_dimension_numbers<[1], [0], [0], [1], [0, 0, 1, 1], [], []>} : vector<8x64xf32>, vector<64x32xf32>, vector<8x32xf32> -> vector<8x32xf32>
    %c0_93 = arith.constant 0 : index
    %c0_94 = arith.constant 0 : index
    %c0_95 = arith.constant 0 : index
    %159 = vector.load %arg13[%c0_93, %c0_94, %c0_95] : memref<1x1x32xf32, #tpu.memory_space<vmem>>, vector<1x1x32xf32>
    %160 = vector.shape_cast %159 : vector<1x1x32xf32> to vector<1x32xf32>
    %161 = vector.broadcast %160 : vector<1x32xf32> to vector<8x32xf32>
    %162 = arith.addf %158, %161 : vector<8x32xf32>
    %cst_96 = arith.constant 5.000000e-01 : f32
    %163 = vector.broadcast %cst_96 : f32 to vector<8x32xf32>
    %164 = arith.mulf %163, %162 : vector<8x32xf32>
    %cst_97 = arith.constant 0.707106769 : f32
    %165 = vector.broadcast %cst_97 : f32 to vector<8x32xf32>
    %166 = arith.mulf %162, %165 : vector<8x32xf32>
    %167 = math.erf %166 : vector<8x32xf32>
    %cst_98 = arith.constant 1.000000e+00 : f32
    %168 = vector.broadcast %cst_98 : f32 to vector<8x32xf32>
    %169 = arith.addf %168, %167 : vector<8x32xf32>
    %170 = arith.mulf %164, %169 : vector<8x32xf32>
    %171 = arith.addf %170, %114 : vector<8x32xf32>
    %c0_99 = arith.constant 0 : index
    %c0_100 = arith.constant 0 : index
    %172 = vector.load %arg15[%c0_99, %c0_100] : memref<8x32xf32, #tpu.memory_space<vmem>>, vector<8x32xf32>
    tpu.vector_store %arg15[%c0_99, %c0_100], %171 {strides = array<i32>} : memref<8x32xf32, #tpu.memory_space<vmem>>, vector<8x32xf32>,
    %c1_i32 = arith.constant 1 : i32
    %173 = arith.cmpi eq, %arg1, %c1_i32 : i32
    %174 = arith.extui %173 : i1 to i32
    %c0_i32_101 = arith.constant 0 : i32
    %175 = arith.cmpi ne, %174, %c0_i32_101 : i32
    scf.if %175 {
      %c0_102 = arith.constant 0 : index
      %c0_103 = arith.constant 0 : index
      %176 = vector.load %arg15[%c0_102, %c0_103] : memref<8x32xf32, #tpu.memory_space<vmem>>, vector<8x32xf32>
      %177 = vector.shape_cast %176 : vector<8x32xf32> to vector<1x8x32xf32>
      %c0_104 = arith.constant 0 : index
      %c0_105 = arith.constant 0 : index
      %c0_106 = arith.constant 0 : index
      %178 = vector.load %arg14[%c0_104, %c0_105, %c0_106] : memref<1x8x32xf32, #tpu.memory_space<vmem>>, vector<1x8x32xf32>
      tpu.vector_store %arg14[%c0_104, %c0_105, %c0_106], %177 {strides = array<i32>} : memref<1x8x32xf32, #tpu.memory_space<vmem>>, vector<1x8x32xf32>,
    } else {
    }
    return
  }
  func.func @transform_0(%arg0: i32, %arg1: i32) -> (i32, i32, i32) {
    %c0_i32 = arith.constant 0 : i32
    %c0_i32_0 = arith.constant 0 : i32
    %c0_i32_1 = arith.constant 0 : i32
    return %arg0, %c0_i32, %c0_i32_0 : i32, i32, i32
  }
  func.func @transform_1(%arg0: i32, %arg1: i32) -> (i32, i32, i32) {
    %c0_i32 = arith.constant 0 : i32
    %c0_i32_0 = arith.constant 0 : i32
    %c0_i32_1 = arith.constant 0 : i32
    return %arg1, %c0_i32, %c0_i32_0 : i32, i32, i32
  }
  func.func @transform_2(%arg0: i32, %arg1: i32) -> (i32, i32, i32) {
    %c0_i32 = arith.constant 0 : i32
    %c0_i32_0 = arith.constant 0 : i32
    %c0_i32_1 = arith.constant 0 : i32
    return %arg1, %c0_i32, %c0_i32_0 : i32, i32, i32
  }
  func.func @transform_3(%arg0: i32, %arg1: i32) -> (i32, i32, i32) {
    %c0_i32 = arith.constant 0 : i32
    %c0_i32_0 = arith.constant 0 : i32
    %c0_i32_1 = arith.constant 0 : i32
    return %arg1, %c0_i32, %c0_i32_0 : i32, i32, i32
  }
  func.func @transform_4(%arg0: i32, %arg1: i32) -> (i32, i32, i32) {
    %c0_i32 = arith.constant 0 : i32
    %c0_i32_0 = arith.constant 0 : i32
    %c0_i32_1 = arith.constant 0 : i32
    return %arg1, %c0_i32, %c0_i32_0 : i32, i32, i32
  }
  func.func @transform_5(%arg0: i32, %arg1: i32) -> (i32, i32, i32) {
    %c0_i32 = arith.constant 0 : i32
    %c0_i32_0 = arith.constant 0 : i32
    %c0_i32_1 = arith.constant 0 : i32
    return %arg1, %c0_i32, %c0_i32_0 : i32, i32, i32
  }
  func.func @transform_6(%arg0: i32, %arg1: i32) -> (i32, i32, i32) {
    %c0_i32 = arith.constant 0 : i32
    %c0_i32_0 = arith.constant 0 : i32
    %c0_i32_1 = arith.constant 0 : i32
    return %arg1, %c0_i32, %c0_i32_0 : i32, i32, i32
  }
  func.func @transform_7(%arg0: i32, %arg1: i32) -> (i32, i32, i32) {
    %c0_i32 = arith.constant 0 : i32
    %c0_i32_0 = arith.constant 0 : i32
    %c0_i32_1 = arith.constant 0 : i32
    return %arg1, %c0_i32, %c0_i32_0 : i32, i32, i32
  }
  func.func @transform_8(%arg0: i32, %arg1: i32) -> (i32, i32, i32) {
    %c0_i32 = arith.constant 0 : i32
    %c0_i32_0 = arith.constant 0 : i32
    %c0_i32_1 = arith.constant 0 : i32
    return %arg1, %c0_i32, %c0_i32_0 : i32, i32, i32
  }
  func.func @transform_9(%arg0: i32, %arg1: i32) -> (i32, i32, i32) {
    %c0_i32 = arith.constant 0 : i32
    %c0_i32_0 = arith.constant 0 : i32
    %c0_i32_1 = arith.constant 0 : i32
    return %arg1, %c0_i32, %c0_i32_0 : i32, i32, i32
  }
  func.func @transform_10(%arg0: i32, %arg1: i32) -> (i32, i32, i32) {
    %c0_i32 = arith.constant 0 : i32
    %c0_i32_0 = arith.constant 0 : i32
    %c0_i32_1 = arith.constant 0 : i32
    return %arg1, %c0_i32, %c0_i32_0 : i32, i32, i32
  }
  func.func @transform_11(%arg0: i32, %arg1: i32) -> (i32, i32, i32) {
    %c0_i32 = arith.constant 0 : i32
    %c0_i32_0 = arith.constant 0 : i32
    %c0_i32_1 = arith.constant 0 : i32
    return %arg1, %c0_i32, %c0_i32_0 : i32, i32, i32
  }
  func.func @transform_12(%arg0: i32, %arg1: i32) -> (i32, i32, i32) {
    %c0_i32 = arith.constant 0 : i32
    %c0_i32_0 = arith.constant 0 : i32
    %c0_i32_1 = arith.constant 0 : i32
    return %arg0, %c0_i32, %c0_i32_0 : i32, i32, i32
  }
}

</mosaic_0001>

<bundles_post_ra>
// kernel: tpu_custom_call.1
= control target key start
LH: loop header
LB: loop body
LE: loop exit
PB: predicated region body
PF: predicated region fallthrough
CT: control target
= control target key end

     0   :  { %s2460_s0 = inlined_call_operand.hbm [shape: f32[2,8,32], index: 0, kind: input, shape index: {}]   ;;  %s2461_s1 = inlined_call_operand.hbm [shape: f32[2,1,32], index: 1, kind: input, shape index: {}]   ;;  %s2462_s2 = inlined_call_operand.hbm [shape: f32[2,1,32], index: 2, kind: input, shape index: {}]   ;;  %s2463_s3 = inlined_call_operand.vmem [shape: f32[2,32,96], index: 3, kind: input, shape index: {}]   ;;  %s2464_s4 = inlined_call_operand.vmem [shape: f32[2,32,32], index: 4, kind: input, shape index: {}]   ;;  %s2465_s5 = inlined_call_operand.vmem [shape: f32[2,1,32], index: 5, kind: input, shape index: {}]   ;;  %s2466_s6 = inlined_call_operand.vmem [shape: f32[2,1,32], index: 6, kind: input, shape index: {}]   ;;  %s2467_s7 = inlined_call_operand.hbm [shape: f32[2,1,32], index: 7, kind: input, shape index: {}]   ;;  %s2468_s8 = inlined_call_operand.vmem [shape: f32[2,32,64], index: 8, kind: input, shape index: {}]   ;;  %s2469_s9 = inlined_call_operand.vmem [shape: f32[2,1,64], index: 9, kind: input, shape index: {}]   ;;  %s2470_s10 = inlined_call_operand.vmem [shape: f32[2,64,32], index: 10, kind: input, shape index: {}]   ;;  %s2471_s11 = inlined_call_operand.vmem [shape: f32[2,1,32], index: 11, kind: input, shape index: {}]   ;;  %s2472_s12 = inlined_call_operand.hbm [shape: f32[2,8,32], index: 12, kind: output, shape index: {}]  }
   0x1   :  { %2486 = sst [smem:[#allocation32_spill]] %s2460_s0 }
   0x2   :  { %2487 = sst [smem:[#allocation33_spill]] %s2461_s1 }
   0x3   :  { %2488 = sst [smem:[#allocation34_spill]] %s2462_s2 }
   0x4   :  { %2489 = sst [smem:[#allocation35_spill]] %s2463_s3 }
   0x5   :  { %2490 = sst [smem:[#allocation36_spill]] %s2464_s4 }
   0x6   :  { %2491 = sst [smem:[#allocation37_spill]] %s2466_s6 }
   0x7   :  { %2492 = sst [smem:[#allocation38_spill]] %s2467_s7 }
   0x8   :  { %2493 = sst [smem:[#allocation39_spill]] %s2468_s8 }
   0x9   :  { %2494 = sst [smem:[#allocation40_spill]] %s2469_s9 }
   0xa   :  { %2495 = sst [smem:[#allocation41_spill]] %s2470_s10 }
   0xb   :  { %2496 = sst [smem:[#allocation42_spill]] %s2471_s11 }
   0xc   :  { %2497 = sst [smem:[#allocation43_spill]] %s2472_s12 }
   0xd   :  { %17 = vsyncpa [#allocation6], 0 }
   0xe   :  { %19 = vsyncpa [#allocation6 + $0x1], 0 }
   0xf   :  { %20 = vsyncpa [#allocation9], 0 }
  0x10   :  { %22 = vsyncpa [#allocation9 + $0x1], 0 }
  0x11   :  { %23 = vsyncpa [#allocation12], 0 }
  0x12   :  { %25 = vsyncpa [#allocation12 + $0x1], 0 }
  0x13   :  { %26 = vsyncpa [#allocation7], 0 }
  0x14   :  { %28 = vsyncpa [#allocation7 + $0x1], 0  ;;  %s2053_s21 = smov 0   ;;  %s2055_s22 = smov 0  }
  0x15   :  { %s2057_s23 = smov 0   ;;  %s2059_s24 = smov 0  }
  0x16   :  { %s2061_s25 = smov 0   ;;  %s2063_s26 = smov 0  }
  0x17   :  { %s2065_s27 = smov 0   ;;  %s2067_s28 = smov 0  }
  0x18   :  { %s2069_s29 = smov 0   ;;  %s2071_s30 = smov 0  }
  0x19   :  { %s2073_s13 = smov 0  }
  0x1a LB: > { %2498 = sst [smem:[#allocation18_spill]] %s1935_s22  ;;  %s2107_s14 = sadd.s32 4294967295, %s1971_s13   ;;  %s1971_s13 = sphi %s2073_s13, %s34_s13   ;;  %s1967_s30 = sphi %s2071_s30, %s2552_s30   ;;  %s1963_s29 = sphi %s2069_s29, %s2551_s29   ;;  %s1959_s28 = sphi %s2067_s28, %s2550_s28   ;;  %s1955_s27 = sphi %s2065_s27, %s2549_s27   ;;  %s1951_s26 = sphi %s2063_s26, %s2548_s26   ;;  %s1947_s25 = sphi %s2061_s25, %s2547_s25   ;;  %s1943_s24 = sphi %s2059_s24, %s2546_s24   ;;  %s1939_s23 = sphi %s2057_s23, %s2545_s23   ;;  %s1935_s22 = sphi %s2055_s22, %s2544_s22   ;;  %s1931_s21 = sphi %s2053_s21, %s2543_s21  }
  0x1b   : > { %2499 = sst [smem:[#allocation19_spill]] %s1939_s23  ;;  %s43_s15 = sadd.s32 1, %s1963_s29 }
  0x1c   : > { %2500 = sst [smem:[#allocation20_spill]] %s1943_s24  ;;  %p2110_p0 = scmp.ge.s32.totalorder %s43_s15, 2 }
  0x1d   : > { %2501 = sst [smem:[#allocation21_spill]] %s1947_s25  ;;  %p61_p1 = scmp.eq.s32.totalorder %s1971_s13, 0 }
  0x1e   : > { %2502 = sst [smem:[#allocation22_spill]] %s1951_s26  ;;  %p67_p2 = scmp.eq.s32.totalorder %s2107_s14, 0 }
  0x1f   : > { %2503 = sst [smem:[#allocation23_spill]] %s1959_s28  ;;  %s79_s17 = sadd.s32 1, %s1939_s23 }
  0x20   : > { %2504 = sst [smem:[#allocation24_spill]] %s1963_s29  ;;  %s2554_s15 = smov (%p2110_p0, %s43_s15), 0 }
  0x21   : > { %2505 = sst [smem:[#allocation25_spill]] %s1967_s30  ;;  %p86_p3 = scmp.ne.s32.totalorder %s1939_s23, %s1935_s22 }
  0x22   : > { %2507 = sst [smem:[#allocation26_spill]] %s2554_s15  ;;  %p92_p4 = scmp.ne.s32.totalorder %s1935_s22, %s1931_s21 }
  0x23   : > { %s76_s18 = ssub.s32 %s1963_s29, %s2554_s15  ;;  %p88_p6 = por %p86_p3, %p61_p1 }
  0x24   : > { %p77_p5 = scmp.eq.s32.totalorder %s76_s18, 0  ;;  %p2130_p7 = por %p92_p4, %p67_p2 }
  0x25   : > { %p1583_p8 = scmp.lt.s32.totalorder %s1971_s13, 4  ;;  %s421_s12 = sand.u32 1, %s1971_s13  }
  0x26   : > { %s2136_s20 = scalar_select %p77_p5, %s1939_s23, %s79_s17  }
  0x27   : > { %s2140_s21 = sand.u32 1, %s1939_s23   ;;  %s2510_s1 = sld [smem:[#allocation33_spill]] }
  0x28   : > { %2509 = sst [smem:[#allocation27_spill]] %s2136_s20  ;;  %s424_s11 = scalar_lea.vmem [#allocation8], %s2140_s21 }
  0x29   : > { %s431_s10 = sshll.u32 %s424_s11, 4  ;;  %p2149_p9 = pnand %p1583_p8, %p88_p6  ;;  %s432_s10 = int_to_ptr.vmem [resolvable:$true] %s431_s10 }
  0x2a   : > { %p1517_p10 = scmp.ge.s32.totalorder %s1971_s13, 1  ;;  %p526_p11 = scmp.lt.s32.totalorder %s1971_s13, 5 }
  0x2b   : > { %s2155_s28 = scalar_lea.sflag [#allocation9], %s421_s12  ;;  %s1512_s15 = sadd.s32 4294967294, %s1971_s13  }
  0x2c   : > { %p2160_p12 = pnand %p1517_p10, %p526_p11  ;;  %p60_p13 = scmp.ne.s32.totalorder %s1951_s26, %s1947_s25 }
  0x2d   : > { %s427_s18 = scalar_lea.hbm %s2510_s1, %s1963_s29  ;;  %s53_s1 = sadd.s32 1, %s1951_s26 }
  0x2e   : > { %s429_s17 = sshll.u32 %s427_s18, 4  ;;  %s46_s18 = sadd.s32 1, %s1967_s30  ;;  %s430_s17 = int_to_ptr.hbm [resolvable:$true] %s429_s17 }
  0x2f   : > { %1572 = dma.hbm_to_vmem [thread:$0]  (!%p2149_p9), %s430_s17, 16, %s432_s10, %s2155_s28  }
  0x30   : > { %s2556_s18 = smov (!%p2110_p0, %s46_s18), %s1967_s30  ;;  %p66_p4 = scmp.ne.s32.totalorder %s1947_s25, %s1943_s24 }
  0x31   : > { %p48_p3 = scmp.ge.s32.totalorder %s2556_s18, 2  ;;  %p2176_p5 = por %p61_p1, %p60_p13 }
  0x32   : > { %p376_p6 = scmp.eq.s32.totalorder %s2107_s14, 3  ;;  %p2185_p10 = por %p67_p2, %p66_p4 }
  0x33   : > { %s2558_s18 = smov (%p48_p3, %s2556_s18), 0  ;;  %p382_p1 = scmp.eq.s32.totalorder %s1512_s15, 3 }
  0x34   : > { %2514 = sst [smem:[#allocation28_spill]] %s2558_s18  ;;  %p2189_p0 = por %p376_p6, %p60_p13 }
  0x35   : > { %s50_s17 = ssub.s32 %s1967_s30, %s2558_s18  ;;  %s402_s23 = sand.u32 1, %s1951_s26  }
  0x36   : > { %s2516_s16 = scalar_select %p2189_p0, 1, 0 }
  0x37   : > { %p51_p11 = scmp.eq.s32.totalorder %s50_s17, 0  ;;  %p2196_p3 = por %p382_p1, %p66_p4 }
  0x38   : > { %2517 = sst [smem:[#allocation29_spill]] %s2516_s16  ;;  %s1515_s8 = sshll.u32 %s402_s23, 3 }
  0x39   : > { %s2518_s24 = scalar_select %p2196_p3, 1, 0 }
  0x3a   : > { %s2201_s9 = scalar_select %p51_p11, %s1951_s26, %s53_s1  }
  0x3b   : > { %2519 = sst [smem:[#allocation30_spill]] %s2518_s24  ;;  %s1516_s6 = sshll.u32 %s1967_s30, 3 }
  0x3c   : > { %2520 = sst [smem:[#allocation31_spill]] %s2201_s9  ;;  %s406_s15 = scalar_lea.vmem [#allocation5], %s1515_s8 }
  0x3d   : > { %s2521_s0 = sld [smem:[#allocation32_spill]]  ;;  %s414_s17 = sshll.u32 %s406_s15, 4  ;;  %s415_s17 = int_to_ptr.vmem [resolvable:$true] %s414_s17 }
  0x3e   : > { %p1567_p2 = pnand %p1583_p8, %p2176_p5  ;;  %s2522_s2 = sld [smem:[#allocation34_spill]] }
  0x3f   : > { %s441_s3 = scalar_lea.vmem [#allocation10], %s2140_s21  ;;  %s2523_s7 = sld [smem:[#allocation38_spill]] }
  0x40   : > { %s448_s4 = sshll.u32 %s441_s3, 4  ;;  %s486_s15 = scalar_lea.vmem [#allocation11], %s2140_s21  ;;  %s449_s4 = int_to_ptr.vmem [resolvable:$true] %s448_s4 }
  0x41   : > { %s484_s9 = scalar_lea.sflag [#allocation12], %s2140_s21 }
  0x43   : > { %s410_s16 = scalar_lea.hbm %s2521_s0, %s1516_s6  ;;  %s403_s6 = scalar_lea.sflag [#allocation6], %s402_s23 }
  0x44   : > { %s412_s18 = sshll.u32 %s410_s16, 4  ;;  %s444_s30 = scalar_lea.hbm %s2522_s2, %s1963_s29  ;;  %s413_s18 = int_to_ptr.hbm [resolvable:$true] %s412_s18 }
  0x45   : > { %s446_s26 = sshll.u32 %s444_s30, 4  ;;  %s489_s12 = scalar_lea.hbm %s2523_s7, %s1963_s29  ;;  %s447_s26 = int_to_ptr.hbm [resolvable:$true] %s446_s26 }
  0x46   : > { %1569 = dma.hbm_to_vmem [thread:$0]  (!%p1567_p2), %s413_s18, 128, %s415_s17, %s403_s6  }
  0x47   : > { %1575 = dma.hbm_to_vmem [thread:$0]  (!%p2149_p9), %s447_s26, 16, %s449_s4, %s2155_s28  }
  0x48   : > { %s493_s0 = sshll.u32 %s486_s15, 4  ;;  %s491_s24 = sshll.u32 %s489_s12, 4  ;;  %s494_s0 = int_to_ptr.vmem [resolvable:$true] %s493_s0  ;;  %s492_s24 = int_to_ptr.hbm [resolvable:$true] %s491_s24 }
  0x49   : > { %1578 = dma.hbm_to_vmem [thread:$0]  (!%p2149_p9), %s492_s24, 16, %s494_s0, %s484_s9  }
  0x4a   : > { %530 = sbr.rel (%p2160_p12) target bundleno = 2474 (0x9aa), region = 68  ;;  %s2230_s23 = sand.u32 (!%p2160_p12), 1, %s1947_s25  }
  0x4b   : > { %s1518_s26 = sshll.u32 (!%p2160_p12), %s2230_s23, 3  ;;  %s533_s30 = scalar_lea.sflag (!%p2160_p12), [#allocation6], %s2230_s23 }
  0x4c   : > { %s536_s28 = scalar_lea.vmem (!%p2160_p12), [#allocation5], %s1518_s26 }
  0x4f   : > { %1914 = dma.done.wait (%p2185_p10), %s533_s30, 128  }
  0x50   : > { %1916 = vsyncadd (%p2185_p10), %s533_s30, 4294967168  ;;  %s542_s0 = sand.u32 1, %s2107_s14   ;;  %s2240_s24 = sand.u32 1, %s1935_s22  }
  0x51   : > { %s543_s20 = scalar_lea.sflag [#allocation9], %s542_s0 }
  0x52   : > { %1918 = dma.done.wait (%p2130_p7), %s543_s20, 32  }
  0x53   : > { %1920 = vsyncadd (%p2130_p7), %s543_s20, 4294967264  ;;  %s561_s18 = scalar_lea.sflag [#allocation12], %s2240_s24 }
  0x54   : > { %1922 = dma.done.wait (%p2130_p7), %s561_s18, 16  }
  0x55   : > { %1924 = vsyncadd (%p2130_p7), %s561_s18, 4294967280  ;;  %p649_p8 = scmp.lt.s32.totalorder %s1955_s27, 1  ;;  %s2524_s19 = sld [smem:[#allocation35_spill]] }
  0x56   : > { %s2525_s9 = sld [smem:[#allocation36_spill]]  ;;  %s2296_s20 = scalar_lea.vmem [#allocation13], %s1518_s26 }
  0x57   : > { %s2256_s14 = scalar_select %p649_p8, %s1955_s27, 1 }
  0x58   : > { %s2526_s18 = sld [smem:[#allocation37_spill]]  ;;  %p1528_p7 = scmp.ne.s32.totalorder %s1955_s27, 0 }
  0x59   : > { %s1552_s17 = sshll.u32 %s2256_s14, 5  ;;  %s2527_s2 = sld [smem:[#allocation39_spill]] }
  0x5a   : > { %s2528_s4 = sld [smem:[#allocation40_spill]]  ;;  %s1555_s8 = sshll.u32 %s2256_s14, 6 }
  0x5b   : > { %s2266_s16 = scalar_lea.vmem %s2524_s19, %s1552_s17  ;;  %s2529_s25 = sld [smem:[#allocation41_spill]] }
  0x5c   : > { %s2271_s30 = scalar_lea.vmem %s2525_s9, %s1552_s17  ;;  %s2530_s22 = sld [smem:[#allocation42_spill]] }
  0x5e   : > { %s664_s10 = scalar_lea.vmem %s2526_s18, %s2256_s14  ;;  %684 = sbr.rel (%p1528_p7) target bundleno = 101 (0x65), region = 88 }
  0x5f   : > { %s2280_s7 = scalar_lea.vmem %s2527_s2, %s1552_s17 }
  0x60   : > { %s672_s6 = scalar_lea.vmem %s2528_s4, %s2256_s14 }
  0x61   : > { %s2290_s12 = scalar_lea.vmem %s2529_s25, %s1555_s8 }
  0x62   : > { %s680_s0 = scalar_lea.vmem %s2530_s22, %s2256_s14 }
  0x63   : > { %v685_v0 = vld [vmem:[%s536_s28] sm:$0xff]  ;;  %vm686_vm0 = vcmask 261120  }
  0x64   : > { %687 = vst.msk [vmem:[#allocation2] sm:$0xff] %vm686_vm0, %v685_v0 }
  0x65 PF: > { %vm691_vm1 = vcmask 261120   ;;  %v1973_v3 = vmov 32.0   ;;  %v732_v15 = vld [vmem:[%s2266_s16 + $0x18] sm:$0xff]  ;;  %v731_v16 = vld [vmem:[%s2266_s16 + $0x10] sm:$0xff]  ;;  %v730_v17 = vld [vmem:[%s2266_s16 + $0x8] sm:$0xff]  ;;  %s2531_s2 = scalar_lea.vmem [#allocation8], %s2240_s24 }
  0x66   : > { %1695 = vrcp.f32 %v1973_v3  ;;  %748 = vmatpush.msra.mxu0 %v732_v15  ;;  %v729_v18 = vld [vmem:[%s2266_s16] sm:$0xff]  ;;  %s2532_s22 = scalar_lea.vmem [#allocation10], %s2240_s24  ;;  %vm756_vm6 = vcmask 785408   ;;  %s1974_s25 = smov 120   ;;  %vm762_vm7 = vcmask 64512   ;;  %vm898_vm8 = vcmask 130112  }
  0x67   : > { %v1688_v28 = vld [vmem:[%s2531_s2] ss:$0 sm:$0xff]  ;;  %s1975_s29 = smov 64   ;;  %s1976_s26 = smov 96   ;;  %vm972_vm9 = vcmask 195712   ;;  %vm1046_vm10 = vcmask 261312  }
  0x68   : > { %749 = vmatpush.msra.mxu0 %v731_v16  ;;  %v1689_v31 = vld [vmem:[%s2532_s22] ss:$0 sm:$0xff]  ;;  %s1977_s28 = smov 72   ;;  %s1978_s21 = smov 88  }
  0x69   : > { %s1979_s11 = smov 56   ;;  %s1980_s17 = smov 80  }
  0x6a   : > { %750 = vmatpush.msra.mxu0 %v730_v17  ;;  %s1981_s4 = smov 104   ;;  %s1982_s16 = smov 112  }
  0x6b   : > { %v2299_v1 = vld [vmem:[#allocation2] sm:$0xff]  ;;  %s1983_s18 = smov 48   ;;  %s1984_s1 = smov 8  }
  0x6c   : > { %v692_v2 = vsel %vm691_vm1, %v2299_v1, 0.0  ;;  %v1696_v4 = vpop.eup %1695  ;;  %751 = vmatpush.msra.mxu0 %v729_v18  ;;  %s1985_s3 = smov 40   ;;  %s1986_s8 = smov 16  }
  0x6d   : > { %693 = vadd.xlane.f32.xlu0 %v692_v2  ;;  %v696_v5 = vmul.f32 32.0, %v1696_v4  ;;  %vm700_vm2 = vweird.f32 %v1696_v4  ;;  %s1987_s19 = smov 24   ;;  %s2533_s2 = scalar_lea.vmem %s2465_s5, %s2256_s14 }
  0x6e   : > { %p1547_p9 = scmp.ne.s32.totalorder %s1955_s27, 1 }
  0x6f   : > { %v697_v6 = vsub.f32 1.0, %v696_v5 }
  0x71   : > { %v698_v7 = vmul.f32 %v1696_v4, %v697_v6 }
  0x73   : > { %v699_v8 = vadd.f32 %v1696_v4, %v698_v7 }
  0x75   : > { %v2303_v9 = vsel %vm700_vm2, %v1696_v4, %v699_v8 }
  0xe0   : > { %v694_v10 = vpop.xlane.xlu0 %693 }
  0xe1   : > { %v702_v11 = vmul.f32 %v2303_v9, %v694_v10 }
  0xe3   : > { %v703_v12 = vsub.f32 %v2299_v1, %v702_v11 }
  0xe5   : > { %v704_v13 = vmul.f32 %v703_v12, %v703_v12 }
  0xe7   : > { %v705_v14 = vsel %vm691_vm1, %v704_v13, 0.0 }
  0xe8   : > { %706 = vadd.xlane.f32.xlu0 %v705_v14 }
 0x15b   : > { %v707_v19 = vpop.xlane.xlu0 %706 }
 0x15c   : > { %v708_v20 = vmul.f32 %v707_v19, %v2303_v9 }
 0x15e   : > { %v709_v21 = vadd.f32 1e-05, %v708_v20 }
 0x160   : > { %1697 = vrsqrt.f32 %v709_v21  ;;  %vm716_vm4 = vweird.f32 %v709_v21 }
 0x166   : > { %v1698_v22 = vpop.eup %1697 }
 0x167   : > { %v711_v23 = vmul.f32 %v1698_v22, %v709_v21  ;;  %vm717_vm3 = vweird.f32 %v1698_v22 }
 0x168   : > { %vm718_vm5 = vmor %vm716_vm4, %vm717_vm3  ;;  %vm1200_vm3 = vcmask 523264  }
 0x169   : > { %v712_v24 = vmul.f32 %v1698_v22, %v711_v23 }
 0x16b   : > { %v713_v25 = vmul.f32 0.5, %v712_v24 }
 0x16d   : > { %v714_v26 = vsub.f32 1.5, %v713_v25 }
 0x16f   : > { %v715_v27 = vmul.f32 %v1698_v22, %v714_v26 }
 0x171   : > { %v719_v29 = vsel %vm718_vm5, %v1698_v22, %v715_v27 }
 0x172   : > { %v720_v30 = vmul.f32 %v719_v29, %v703_v12 }
 0x174   : > { %v724_v32 = vmul.f32 %v1688_v28, %v720_v30 }
 0x176   : > { %v728_v33 = vadd.f32 %v1689_v31, %v724_v32 }
 0x178   : > { %1529 = vmatmul.msk.f32.vlgmr.msra.gmra.mxu0 %vm691_vm1, %v728_v33 }
 0x1f5   : > { %v753_v34 = vpop.f32.mrf.mxu0 }
 0x1f6   : > { %757 = vst.msk [vmem:[#allocation3] sm:$0xff] %vm756_vm6, %v753_v34  ;;  %v1052_v34 = vld [vmem:[%s2271_s30 + $0x18] sm:$0xff] }
 0x1fd   : > { %v2318_v35 = vld [vmem:[#allocation3] sm:$0xff] }
 0x1fe   : > { %828 = vrot.lane.b32.xlu2 %v2318_v35, %s1974_s25  ;;  %799 = vrot.lane.b32.xlu0 %v2318_v35, %s1975_s29  ;;  %s2535_s25 = scalar_lea.vmem [#allocation11], %s2240_s24 }
 0x1ff   : > { %760 = vrot.lane.b32.xlu1 %v2318_v35, %s1976_s26 }
 0x206   : > { %978 = vrot.lane.b32.xlu0 %v2318_v35, %s1977_s28 }
 0x207   : > { %830 = vrot.lane.b32.xlu1 %v2318_v35, %s1978_s21 }
 0x258   : > { %v829_v39 = vpop.permute.xlu2 %828 }
 0x270   : > { %v800_v36 = vpop.permute.xlu0 %799 }
 0x271   : > { %v761_v37 = vpop.permute.xlu1 %760  ;;  %820 = vmatpush.msra.mxu2 %v800_v36  ;;  %v1050_v36 = vld [vmem:[%s2271_s30 + $0x8] sm:$0xff] }
 0x272   : > { %1530 = vmatpush.xpose.msk.msra.mxu1 %vm762_vm7, %v761_v37  ;;  %v1049_v37 = vld [vmem:[%s2271_s30] sm:$0xff] }
 0x275   : > { %1531 = vmatmul.msk.f32.vlgmr.msra.gmra.mxu1 %vm762_vm7, %v2318_v35 }
 0x278   : > { %v979_v49 = vpop.permute.xlu0 %978 }
 0x279   : > { %v831_v38 = vpop.permute.xlu1 %830 }
 0x27a   : > { %1533 = vmatpush.xpose.msk.msra.mxu3 %vm762_vm7, %v831_v38 }
 0x27d   : > { %1534 = vmatmul.msk.f32.vlgmr.msra.gmra.mxu3 %vm762_vm7, %v829_v39 }
 0x2f2   : > { %v784_v40 = vpop.f32.mrf.mxu1 }
 0x2f3   : > { %v787_v41 = vmul.f32 0.17677669, %v784_v40 }
 0x2f5   : > { %v788_v42 = vsel %vm762_vm7, %v787_v41, -inf }
 0x2f6   : > { %789 = vmax.xlane.f32.xlu2 %v788_v42 }
 0x300   : > { %v853_v43 = vpop.f32.mrf.mxu3 }
 0x301   : > { %v856_v44 = vmul.f32 0.17677669, %v853_v43 }
 0x303   : > { %v857_v45 = vsel %vm762_vm7, %v856_v44, -inf }
 0x304   : > { %858 = vmax.xlane.f32.xlu0 %v857_v45 }
 0x30e   : > { %868 = vrot.lane.b32.xlu2 %v2318_v35, %s1979_s11 }
 0x318   : > { %904 = vrot.lane.b32.xlu0 %v2318_v35, %s1980_s17 }
 0x369   : > { %v790_v46 = vpop.xlane.xlu2 %789 }
 0x36a   : > { %v791_v47 = vsub.f32 %v787_v41, %v790_v46  ;;  %v1690_v41 = vld [vmem:[%s2533_s2] ss:$0 sm:$0xff] }
 0x36c   : > { %v792_v48 = vmul.f32 1.442695, %v791_v47 }
 0x36e   : > { %1699 = vpow2.f32 %v792_v48 }
 0x371   : > { %v869_v50 = vpop.permute.xlu2 %868 }
 0x372   : > { %889 = vmatpush.msrb.mxu2 %v869_v50 }
 0x374   : > { %v1700_v51 = vpop.eup %1699 }
 0x375   : > { %v794_v52 = vsel %vm762_vm7, %v1700_v51, 0.0 }
 0x376   : > { %795 = vadd.xlane.f32.xlu1 %v794_v52  ;;  %v1115_v52 = vld [vmem:[%s2280_s7 + $0x10] sm:$0xff] }
 0x377   : > { %v859_v53 = vpop.xlane.xlu0 %858 }
 0x378   : > { %v860_v54 = vsub.f32 %v856_v44, %v859_v53  ;;  %v1114_v53 = vld [vmem:[%s2280_s7 + $0x8] sm:$0xff] }
 0x37a   : > { %v861_v55 = vmul.f32 1.442695, %v860_v54 }
 0x37c   : > { %1701 = vpow2.f32 %v861_v55 }
 0x382   : > { %v1702_v56 = vpop.eup %1701 }
 0x383   : > { %v863_v57 = vsel %vm762_vm7, %v1702_v56, 0.0 }
 0x384   : > { %864 = vadd.xlane.f32.xlu0 %v863_v57 }
 0x38a   : > { %v905_v58 = vpop.permute.xlu0 %904 }
 0x38b   : > { %1536 = vmatpush.xpose.msk.msrb.mxu1 %vm762_vm7, %v905_v58 }
 0x38f   : > { %976 = vrot.lane.b32.xlu1 %v2318_v35, %s1981_s4  ;;  %1072 = vmatpush.msra.mxu1 %v1052_v34 }
 0x398   : > { %902 = vrot.lane.b32.xlu0 %v2318_v35, %s1982_s16 }
 0x3e9   : > { %v796_v59 = vpop.xlane.xlu1 %795 }
 0x3ea   : > { %1703 = vrcp.f32 %v796_v59 }
 0x3f0   : > { %v1704_v60 = vpop.eup %1703 }
 0x3f1   : > { %v798_v61 = vmul.f32 %v1704_v60, %v1700_v51  ;;  %v1116_v51 = vld [vmem:[%s2280_s7 + $0x18] sm:$0xff] }
 0x3f3   : > { %1532 = vmatmul.msk.f32.vlgmr.msra.gmra.mxu2 %vm762_vm7, %v798_v61 }
 0x3f4   : > { %1539 = vmatpush.xpose.msk.msra.mxu2 %vm762_vm7, %v979_v49 }
 0x3f7   : > { %v865_v62 = vpop.xlane.xlu0 %864 }
 0x3f8   : > { %1705 = vrcp.f32 %v865_v62 }
 0x3fe   : > { %v1706_v63 = vpop.eup %1705 }
 0x3ff   : > { %v867_v0 = vmul.f32 %v1706_v63, %v1702_v56  ;;  %v1691_v63 = vld [vmem:[%s664_s10] ss:$0 sm:$0xff] }
 0x401   : > { %1535 = vmatmul.msk.f32.vlgmr.msrb.gmra.mxu2 %vm762_vm7, %v867_v0  ;;  %v977_v2 = vpop.permute.xlu1 %976 }
 0x409   : > { %1540 = vmatmul.msk.f32.vlgmr.msra.gmra.mxu2 %vm762_vm7, %v977_v2  ;;  %v1692_v2 = vld [vmem:[%s2535_s25] ss:$0 sm:$0xff] }
 0x40a   : > { %v903_v3 = vpop.permute.xlu0 %902 }
 0x40b   : > { %1537 = vmatmul.msk.f32.vlgmr.msrb.gmra.mxu1 %vm762_vm7, %v903_v3 }
 0x476   : > { %v822_v4 = vpop.f32.mrf.mxu2 }
 0x477   : > { %825 = vst.msk [vmem:[#allocation4] sm:$0xff] %vm762_vm7, %v822_v4 }
 0x484   : > { %v891_v5 = vpop.f32.mrf.mxu2 }
 0x488   : > { %v927_v6 = vpop.f32.mrf.mxu1 }
 0x489   : > { %v930_v7 = vmul.f32 0.17677669, %v927_v6 }
 0x48b   : > { %v931_v8 = vsel %vm762_vm7, %v930_v7, -inf }
 0x48c   : > { %932 = vmax.xlane.f32.xlu2 %v931_v8  ;;  %v1001_v10 = vpop.f32.mrf.mxu2 }
 0x48d   : > { %v1004_v11 = vmul.f32 0.17677669, %v1001_v10 }
 0x48f   : > { %v1005_v12 = vsel %vm762_vm7, %v1004_v11, -inf }
 0x490   : > { %1006 = vmax.xlane.f32.xlu0 %v1005_v12  ;;  %v1195_v12 = vld [vmem:[%s2290_s12 + $0x38] sm:$0xff] }
 0x491   : > { %1212 = vmatpush.msrb.mxu0 %v1195_v12 }
 0x4a4   : > { %942 = vrot.lane.b32.xlu0 %v2318_v35, %s1983_s18 }
 0x4ff   : > { %v933_v13 = vpop.xlane.xlu2 %932 }
 0x500   : > { %v934_v14 = vsub.f32 %v930_v7, %v933_v13 }
 0x502   : > { %v935_v15 = vmul.f32 1.442695, %v934_v14 }
 0x503   : > { %v1007_v16 = vpop.xlane.xlu0 %1006 }
 0x504   : > { %1707 = vpow2.f32 %v935_v15  ;;  %v1008_v17 = vsub.f32 %v1004_v11, %v1007_v16  ;;  %v1194_v15 = vld [vmem:[%s2290_s12 + $0x30] sm:$0xff] }
 0x505   : > { %1213 = vmatpush.msrb.mxu0 %v1194_v15 }
 0x506   : > { %v1009_v18 = vmul.f32 1.442695, %v1008_v17 }
 0x508   : > { %1709 = vpow2.f32 %v1009_v18  ;;  %v1193_v18 = vld [vmem:[%s2290_s12 + $0x28] sm:$0xff] }
 0x509   : > { %1214 = vmatpush.msrb.mxu0 %v1193_v18 }
 0x50a   : > { %v1708_v19 = vpop.eup %1707 }
 0x50b   : > { %v937_v20 = vsel %vm762_vm7, %v1708_v19, 0.0 }
 0x50c   : > { %938 = vadd.xlane.f32.xlu1 %v937_v20 }
 0x50e   : > { %v1710_v21 = vpop.eup %1709 }
 0x50f   : > { %v1011_v22 = vsel %vm762_vm7, %v1710_v21, 0.0 }
 0x510   : > { %1012 = vadd.xlane.f32.xlu2 %v1011_v22 }
 0x516   : > { %v943_v23 = vpop.permute.xlu0 %942 }
 0x517   : > { %963 = vmatpush.msrb.mxu3 %v943_v23  ;;  %v1191_v23 = vld [vmem:[%s2290_s12 + $0x18] sm:$0xff] }
 0x519   : > { %1136 = vmatpush.msra.mxu3 %v1116_v51 }
 0x51b   : > { %1137 = vmatpush.msra.mxu3 %v1115_v52 }
 0x51d   : > { %1138 = vmatpush.msra.mxu3 %v1114_v53 }
 0x525   : > { %895 = vrot.lane.b32.xlu1 %v891_v5, %s1984_s1  ;;  %v1693_v5 = vld [vmem:[%s672_s6] ss:$0 sm:$0xff] }
 0x528   : > { %1016 = vrot.lane.b32.xlu2 %v2318_v35, %s1985_s3  ;;  %v1051_v35 = vld [vmem:[%s2271_s30 + $0x10] sm:$0xff] }
 0x529   : > { %1073 = vmatpush.msra.mxu1 %v1051_v35 }
 0x52b   : > { %1074 = vmatpush.msra.mxu1 %v1050_v36 }
 0x52d   : > { %1075 = vmatpush.msra.mxu1 %v1049_v37 }
 0x57f   : > { %v939_v24 = vpop.xlane.xlu1 %938 }
 0x580   : > { %1711 = vrcp.f32 %v939_v24 }
 0x583   : > { %v1013_v25 = vpop.xlane.xlu2 %1012 }
 0x584   : > { %1713 = vrcp.f32 %v1013_v25 }
 0x586   : > { %v1712_v26 = vpop.eup %1711 }
 0x587   : > { %v941_v27 = vmul.f32 %v1712_v26, %v1708_v19  ;;  %v1190_v26 = vld [vmem:[%s2290_s12 + $0x10] sm:$0xff] }
 0x589   : > { %1538 = vmatmul.msk.f32.vlgmr.msrb.gmra.mxu3 %vm762_vm7, %v941_v27 }
 0x58a   : > { %v1714_v28 = vpop.eup %1713 }
 0x58b   : > { %v1015_v29 = vmul.f32 %v1714_v28, %v1710_v21  ;;  %v1017_v30 = vpop.permute.xlu2 %1016  ;;  %v1192_v21 = vld [vmem:[%s2290_s12 + $0x20] sm:$0xff]  ;;  %v1189_v28 = vld [vmem:[%s2290_s12 + $0x8] sm:$0xff] }
 0x58c   : > { %1037 = vmatpush.msrb.mxu2 %v1017_v30  ;;  %1215 = vmatpush.msrb.mxu0 %v1192_v21  ;;  %v1188_v30 = vld [vmem:[%s2290_s12] sm:$0xff] }
 0x58d   : > { %1541 = vmatmul.msk.f32.vlgmr.msrb.gmra.mxu2 %vm762_vm7, %v1015_v29 }
 0x58e   : > { %1216 = vmatpush.msrb.mxu0 %v1191_v23 }
 0x590   : > { %1217 = vmatpush.msrb.mxu0 %v1190_v26 }
 0x592   : > { %1218 = vmatpush.msrb.mxu0 %v1189_v28 }
 0x594   : > { %1219 = vmatpush.msrb.mxu0 %v1188_v30 }
 0x597   : > { %v896_v31 = vpop.permute.xlu1 %895 }
 0x598   : > { %899 = vst.msk [vmem:[#allocation4] sm:$0xff] %vm898_vm8, %v896_v31 }
 0x60c   : > { %v965_v32 = vpop.f32.mrf.mxu3 }
 0x60d   : > { %969 = vrot.lane.b32.xlu0 %v965_v32, %s1986_s8 }
 0x610   : > { %v1039_v33 = vpop.f32.mrf.mxu2 }
 0x615   : > { %1043 = vrot.lane.b32.xlu0 %v1039_v33, %s1987_s19 }
 0x67f   : > { %v970_v38 = vpop.permute.xlu0 %969 }
 0x680   : > { %973 = vst.msk [vmem:[#allocation4] sm:$0xff] %vm972_vm9, %v970_v38 }
 0x687   : > { %v1044_v39 = vpop.permute.xlu0 %1043 }
 0x688   : > { %1047 = vst.msk [vmem:[#allocation4] sm:$0xff] %vm1046_vm10, %v1044_v39 }
 0x68f   : > { %v1048_v40 = vld [vmem:[#allocation4] sm:$0xff] }
 0x690   : > { %1542 = vmatmul.msk.f32.vlgmr.msra.gmra.mxu1 %vm691_vm1, %v1048_v40 }
 0x70d   : > { %v1077_v42 = vpop.f32.mrf.mxu1 }
 0x70e   : > { %v1078_v43 = vadd.f32 %v1690_v41, %v1077_v42 }
 0x710   : > { %v2364_v44 = vadd.f32 %v1078_v43, %v2299_v1  ;;  %v1113_v1 = vld [vmem:[%s2280_s7] sm:$0xff] }
 0x711   : > { %1139 = vmatpush.msra.mxu3 %v1113_v1 }
 0x712   : > { %v1083_v45 = vsel %vm691_vm1, %v2364_v44, 0.0 }
 0x713   : > { %1084 = vadd.xlane.f32.xlu2 %v1083_v45 }
 0x786   : > { %v1085_v46 = vpop.xlane.xlu2 %1084 }
 0x787   : > { %v1086_v47 = vmul.f32 %v1085_v46, %v2303_v9 }
 0x789   : > { %v1087_v48 = vsub.f32 %v2364_v44, %v1086_v47 }
 0x78b   : > { %v1088_v49 = vmul.f32 %v1087_v48, %v1087_v48 }
 0x78d   : > { %v1089_v50 = vsel %vm691_vm1, %v1088_v49, 0.0 }
 0x78e   : > { %1090 = vadd.xlane.f32.xlu1 %v1089_v50 }
 0x801   : > { %v1091_v54 = vpop.xlane.xlu1 %1090 }
 0x802   : > { %v1092_v55 = vmul.f32 %v1091_v54, %v2303_v9 }
 0x804   : > { %v1093_v56 = vadd.f32 1e-05, %v1092_v55 }
 0x806   : > { %1715 = vrsqrt.f32 %v1093_v56  ;;  %vm1100_vm12 = vweird.f32 %v1093_v56 }
 0x80c   : > { %v1716_v57 = vpop.eup %1715 }
 0x80d   : > { %v1095_v58 = vmul.f32 %v1716_v57, %v1093_v56  ;;  %vm1101_vm11 = vweird.f32 %v1716_v57  ;;  %v1694_v56 = vld [vmem:[%s680_s0] ss:$0 sm:$0xff] }
 0x80e   : > { %vm1102_vm13 = vmor %vm1100_vm12, %vm1101_vm11 }
 0x80f   : > { %v1096_v59 = vmul.f32 %v1716_v57, %v1095_v58 }
 0x811   : > { %v1097_v60 = vmul.f32 0.5, %v1096_v59 }
 0x813   : > { %v1098_v61 = vsub.f32 1.5, %v1097_v60 }
 0x815   : > { %v1099_v62 = vmul.f32 %v1716_v57, %v1098_v61 }
 0x817   : > { %v1103_v0 = vsel %vm1102_vm13, %v1716_v57, %v1099_v62 }
 0x818   : > { %v1104_v9 = vmul.f32 %v1103_v0, %v1087_v48 }
 0x81a   : > { %v1108_v3 = vmul.f32 %v1691_v63, %v1104_v9 }
 0x81c   : > { %v1112_v4 = vadd.f32 %v1692_v2, %v1108_v3 }
 0x81e   : > { %1543 = vmatmul.msk.f32.vlgmr.msra.gmra.mxu3 %vm691_vm1, %v1112_v4 }
 0x8a1   : > { %v1141_v6 = vpop.f32.mrf.mxu3 }
 0x8a2   : > { %v1142_v7 = vadd.f32 %v1693_v5, %v1141_v6 }
 0x8a4   : > { %v1145_v8 = vmul.f32 0.70710677, %v1142_v7  ;;  %v1144_v1 = vmul.f32 0.5, %v1142_v7 }
 0x8a6   : > { %v1146_v10 = vmul.f32 %v1145_v8, %v1145_v8 }
 0x8a8   : > { %v1147_v11 = vmin.f32 %v1146_v10, 16.0 }
 0x8aa   : > { %v1148_v13 = vmul.f32 2.1237322e-06, %v1147_v11  ;;  %v1159_v14 = vmul.f32 3.8918573e-05, %v1147_v11 }
 0x8ac   : > { %v1149_v16 = vadd.f32 0.00028619796, %v1148_v13  ;;  %v1160_v17 = vadd.f32 0.001143296, %v1159_v14 }
 0x8ae   : > { %v1150_v19 = vmul.f32 %v1149_v16, %v1147_v11  ;;  %v1161_v20 = vmul.f32 %v1160_v17, %v1147_v11 }
 0x8b0   : > { %v1162_v22 = vadd.f32 0.014752088, %v1161_v20  ;;  %v1151_v24 = vadd.f32 0.0036580483, %v1150_v19 }
 0x8b2   : > { %v1163_v25 = vmul.f32 %v1162_v22, %v1147_v11  ;;  %v1152_v29 = vmul.f32 %v1151_v24, %v1147_v11 }
 0x8b4   : > { %v1164_v27 = vadd.f32 0.112945676, %v1163_v25  ;;  %v1153_v33 = vadd.f32 0.05243302, %v1152_v29 }
 0x8b6   : > { %v1165_v31 = vmul.f32 %v1164_v27, %v1147_v11  ;;  %v1154_v36 = vmul.f32 %v1153_v33, %v1147_v11 }
 0x8b8   : > { %v1166_v32 = vadd.f32 0.4994258, %v1165_v31  ;;  %v1155_v37 = vadd.f32 0.18741608, %v1154_v36 }
 0x8ba   : > { %v1167_v34 = vmul.f32 %v1166_v32, %v1147_v11  ;;  %v1156_v39 = vmul.f32 %v1155_v37, %v1147_v11 }
 0x8bc   : > { %v1168_v35 = vadd.f32 1.0, %v1167_v34  ;;  %v1157_v43 = vadd.f32 1.1283791, %v1156_v39 }
 0x8be   : > { %1717 = vrcp.f32 %v1168_v35  ;;  %v1180_v42 = vand.u32 2147483648, %v1168_v35  ;;  %v1178_v46 = vand.u32 2147483647, %v1168_v35  ;;  %vm1174_vm15 = vweird.f32 %v1168_v35 }
 0x8bf   : > { %v1158_v49 = vmul.f32 %v1157_v43, %v1145_v8 }
 0x8c0   : > { %v1181_v48 = vor.u32 1.1754944e-38, %v1180_v42  ;;  %vm1179_vm2 = vcmp.eq.f32.partialorder %v1178_v46, 8.507059e+37 }
 0x8c4   : > { %v1718_v38 = vpop.eup %1717 }
 0x8c5   : > { %v1170_v40 = vmul.f32 %v1718_v38, %v1168_v35  ;;  %vm1175_vm14 = vweird.f32 %v1718_v38 }
 0x8c6   : > { %vm1176_vm0 = vmor %vm1174_vm15, %vm1175_vm14 }
 0x8c7   : > { %v1171_v41 = vsub.f32 1.0, %v1170_v40 }
 0x8c9   : > { %v1172_v45 = vmul.f32 %v1718_v38, %v1171_v41 }
 0x8cb   : > { %v1173_v47 = vadd.f32 %v1718_v38, %v1172_v45 }
 0x8cd   : > { %v1177_v50 = vsel %vm1176_vm0, %v1718_v38, %v1173_v47 }
 0x8ce   : > { %v1182_v51 = vsel %vm1179_vm2, %v1181_v48, %v1177_v50 }
 0x8cf   : > { %v1183_v52 = vmul.f32 %v1182_v51, %v1158_v49 }
 0x8d1   : > { %v1544_v53 = vclamps-f32 %v1183_v52, 1.0 }
 0x8d3   : > { %v1186_v54 = vadd.f32 1.0, %v1544_v53 }
 0x8d5   : > { %v1187_v55 = vmul.f32 %v1186_v54, %v1144_v1 }
 0x8d7   : > { %1545 = vmatmul.msk.f32.vlgmr.msrb.gmra.mxu0 %vm1200_vm3, %v1187_v55 }
 0x954   : > { %v1221_v57 = vpop.f32.mrf.mxu0 }
 0x955   : > { %v1222_v58 = vadd.f32 %v1694_v56, %v1221_v57 }
 0x957   : > { %v1225_v59 = vmul.f32 0.70710677, %v1222_v58  ;;  %v1224_v32 = vmul.f32 0.5, %v1222_v58 }
 0x959   : > { %v1226_v60 = vmul.f32 %v1225_v59, %v1225_v59 }
 0x95b   : > { %v1227_v61 = vmin.f32 %v1226_v60, 16.0 }
 0x95d   : > { %v1228_v62 = vmul.f32 2.1237322e-06, %v1227_v61  ;;  %v1239_v63 = vmul.f32 3.8918573e-05, %v1227_v61 }
 0x95f   : > { %v1229_v0 = vadd.f32 0.00028619796, %v1228_v62  ;;  %v1240_v9 = vadd.f32 0.001143296, %v1239_v63 }
 0x961   : > { %v1230_v2 = vmul.f32 %v1229_v0, %v1227_v61  ;;  %v1241_v3 = vmul.f32 %v1240_v9, %v1227_v61 }
 0x963   : > { %v1242_v4 = vadd.f32 0.014752088, %v1241_v3  ;;  %v1231_v5 = vadd.f32 0.0036580483, %v1230_v2 }
 0x965   : > { %v1243_v6 = vmul.f32 %v1242_v4, %v1227_v61  ;;  %v1232_v8 = vmul.f32 %v1231_v5, %v1227_v61 }
 0x967   : > { %v1244_v7 = vadd.f32 0.112945676, %v1243_v6  ;;  %v1233_v12 = vadd.f32 0.05243302, %v1232_v8 }
 0x969   : > { %v1245_v10 = vmul.f32 %v1244_v7, %v1227_v61  ;;  %v1234_v15 = vmul.f32 %v1233_v12, %v1227_v61 }
 0x96b   : > { %v1246_v11 = vadd.f32 0.4994258, %v1245_v10  ;;  %v1235_v16 = vadd.f32 0.18741608, %v1234_v15 }
 0x96d   : > { %v1247_v13 = vmul.f32 %v1246_v11, %v1227_v61  ;;  %v1236_v18 = vmul.f32 %v1235_v16, %v1227_v61 }
 0x96f   : > { %v1248_v14 = vadd.f32 1.0, %v1247_v13  ;;  %v1237_v22 = vadd.f32 1.1283791, %v1236_v18 }
 0x971   : > { %1719 = vrcp.f32 %v1248_v14  ;;  %v1260_v21 = vand.u32 2147483648, %v1248_v14  ;;  %v1258_v24 = vand.u32 2147483647, %v1248_v14  ;;  %vm1254_vm5 = vweird.f32 %v1248_v14 }
 0x972   : > { %v1238_v27 = vmul.f32 %v1237_v22, %v1225_v59 }
 0x973   : > { %v1261_v26 = vor.u32 1.1754944e-38, %v1260_v21  ;;  %vm1259_vm7 = vcmp.eq.f32.partialorder %v1258_v24, 8.507059e+37 }
 0x977   : > { %v1720_v17 = vpop.eup %1719 }
 0x978   : > { %v1250_v19 = vmul.f32 %v1720_v17, %v1248_v14  ;;  %vm1255_vm4 = vweird.f32 %v1720_v17 }
 0x979   : > { %vm1256_vm6 = vmor %vm1254_vm5, %vm1255_vm4 }
 0x97a   : > { %v1251_v20 = vsub.f32 1.0, %v1250_v19 }
 0x97c   : > { %v1252_v23 = vmul.f32 %v1720_v17, %v1251_v20 }
 0x97e   : > { %v1253_v25 = vadd.f32 %v1720_v17, %v1252_v23 }
 0x980   : > { %v1257_v28 = vsel %vm1256_vm6, %v1720_v17, %v1253_v25 }
 0x981   : > { %v1262_v29 = vsel %vm1259_vm7, %v1261_v26, %v1257_v28 }
 0x982   : > { %v1263_v30 = vmul.f32 %v1262_v29, %v1238_v27 }
 0x984   : > { %v1546_v31 = vclamps-f32 %v1263_v30, 1.0 }
 0x986   : > { %v1266_v33 = vadd.f32 1.0, %v1546_v31 }
 0x988   : > { %v1267_v34 = vmul.f32 %v1266_v33, %v1224_v32  ;;  %1273 = sbr.rel (%p1547_p9) target bundleno = 2453 (0x995), region = 92 }
 0x98a   : > { %v1268_v35 = vadd.f32 %v1267_v34, %v2364_v44 }
 0x98c   : > { %1269 = vst.msk [vmem:[#allocation2] sm:$0xff] %vm691_vm1, %v1268_v35 }
 0x993   : > { %v1274_v36 = vld [vmem:[#allocation2] sm:$0xff] }
 0x994   : > { %1275 = vst.msk [vmem:[%s2296_s20] sm:$0xff] %vm691_vm1, %v1274_v36 }
 0x995 PF: > { %s2538_s14 = sld [smem:[#allocation23_spill]]  ;;  %s1289_s16 = sshll.u32 %s2296_s20, 4  ;;  %s1290_s16 = int_to_ptr.vmem [resolvable:$true] %s1289_s16 }
 0x996   : > { %s2540_s17 = sld [smem:[#allocation43_spill]]  ;;  %s1277_s27 = scalar_lea.sflag [#allocation7], %s2230_s23 }
 0x99b   : > { %s1549_s0 = sshll.u32 %s2538_s14, 3 }
 0x99c   : > { %s1287_s4 = scalar_lea.hbm %s2540_s17, %s1549_s0  ;;  %s1861_s15 = scalar_lea.hbm %s2540_s17, 16 }
 0x99d   : > { %s1291_s18 = sshll.u32 %s1287_s4, 4  ;;  %s1292_s18 = int_to_ptr.hbm [resolvable:$true] %s1291_s18 }
 0x99e   : > { %s1855_s1 = sshra.s32 %s1292_s18, 4  ;;  %s1856_s1 = int_to_ptr.hbm [resolvable:$true] %s1855_s1 }
 0x99f   : > { %s1857_s3 = scalar_lea.hbm %s1856_s1, 8  ;;  %p1862_p5 = scmp.lt.s32.totalorder %s1856_s1, %s2540_s17 }
 0x9a0   : > { %p1858_p12 = scmp.ne.s32.totalorder %s1856_s1, %s1857_s3  ;;  %p1863_p6 = scmp.lt.s32.totalorder %s1861_s15, %s1857_s3 }
 0x9a2   : > { %p1859_p13 = pnand %p1858_p12, %p2189_p0  ;;  %p1864_p10 = por %p1863_p6, %p1862_p5 }
 0x9a4   : > { %p1860_p4 = pneg %p1859_p13 }
 0x9a6   : > { %p1865_p1 = pnand %p1864_p10, %p1860_p4 }
 0x9a8   : > { %1868 = shalt.err (!%p1865_p1)
}
 0x9a9   : > { %1564 = dma.vmem_to_hbm [thread:$0]  (%p2189_p0), %s1290_s16, 128, %s1292_s18, %s1277_s27  }
 0x9aa PF: > { %s2541_s23 = sld [smem:[#allocation20_spill]]  ;;  %p1584_p11 = scmp.ge.s32.totalorder %s1971_s13, 2 }
 0x9ac   : > { %p1580_p2 = pnand %p1584_p11, %p2196_p3 }
 0x9ae   : > { %p1581_p8 = pneg %p1580_p2 }
 0x9b0   : > { %s1303_s30 = sand.u32 1, %s2541_s23  }
 0x9b1   : > { %s1304_s7 = scalar_lea.sflag [#allocation7], %s1303_s30 }
 0x9b2   : > { %1926 = dma.done.wait (%p1581_p8), %s1304_s7, 128  }
 0x9b3   : > { %1928 = vsyncadd (%p1581_p8), %s1304_s7, 4294967168  ;;  %s34_s13 = sadd.s32 1, %s1971_s13   ;;  %s2543_s21 = sld [smem:[#allocation18_spill]] }
 0x9b4   : > { %p31_p7 = scmp.ge.s32.totalorder %s34_s13, 6   ;;  %s2544_s22 = sld [smem:[#allocation19_spill]] }
 0x9b5   : > { %s2545_s23 = sld [smem:[#allocation27_spill]] }
 0x9b6   : > { %s2546_s24 = sld [smem:[#allocation21_spill]] }
 0x9b7   : > { %s2547_s25 = sld [smem:[#allocation22_spill]] }
 0x9b8   : > { %s2548_s26 = sld [smem:[#allocation31_spill]]  ;;  %33 = sbr.rel (!%p31_p7) target bundleno = 26 (0x1a), region = 182 }
 0x9b9   : > { %s2549_s27 = sld [smem:[#allocation24_spill]] }
 0x9ba   : > { %s2550_s28 = sld [smem:[#allocation25_spill]] }
 0x9bb   : > { %s2551_s29 = sld [smem:[#allocation26_spill]] }
 0x9bc   : > { %s2552_s30 = sld [smem:[#allocation28_spill]] }
 0x9bd   :  { %1310 = vsyncpa [#allocation6], 1 }
 0x9be   :  { %1312 = vsyncpa [#allocation6 + $0x1], 1 }
 0x9bf   :  { %1313 = vsyncpa [#allocation9], 1 }
 0x9c0   :  { %1315 = vsyncpa [#allocation9 + $0x1], 1 }
 0x9c1   :  { %1316 = vsyncpa [#allocation12], 1 }
 0x9c2   :  { %1318 = vsyncpa [#allocation12 + $0x1], 1 }
 0x9c3   :  { %1319 = vsyncpa [#allocation7], 1 }
 0x9c4   :  { %1321 = vsyncpa [#allocation7 + $0x1], 1 }

</bundles_post_ra>
